<compile_context>
chip_gen: v7x
topology: tpu7x:2x2x1
jax: 0.10.0
libtpu: 0.0.40
codegen_flags: <defaults>
</compile_context>

<pallas_src>
import jax
import jax.numpy as jnp
from jax.experimental import pallas as pl
from jax.experimental.pallas import tpu as pltpu

E = 512  # embedding width (module default e=512)


def _round_up(x, m):
    return ((x + m - 1) // m) * m


def _value_head_kernel(x_ref, w1_ref, b1_ref, w2_ref, b2_ref,
                       w3_ref, b3_ref, w4_ref, b4_ref, o_ref):
    # x tile: [tile_b, E]; cast to bf16 for the MXU (no-op if already bf16).
    x = x_ref[...].astype(jnp.bfloat16)

    # Three (matmul + bias + ReLU) layers: bf16 inputs, f32 accumulation.
    h = jnp.dot(x, w1_ref[...], preferred_element_type=jnp.float32) + b1_ref[...]
    h = jnp.maximum(h, 0.0).astype(jnp.bfloat16)
    h = jnp.dot(h, w2_ref[...], preferred_element_type=jnp.float32) + b2_ref[...]
    h = jnp.maximum(h, 0.0).astype(jnp.bfloat16)
    h = jnp.dot(h, w3_ref[...], preferred_element_type=jnp.float32) + b3_ref[...]
    h = jnp.maximum(h, 0.0).astype(jnp.bfloat16)

    # Layer 4 in transposed form: [1, E] . [tile_b, E]^T -> [1, tile_b] (lane-dense).
    z = jax.lax.dot_general(
        w4_ref[...], h,
        dimension_numbers=(((1,), (1,)), ((), ())),
        preferred_element_type=jnp.float32,
    )
    z = z + b4_ref[0]                      # scalar bias from SMEM
    o_ref[0] = jax.nn.sigmoid(z)           # store full [1, tile_b] row


def karel_sequential_value(embedding, params, *, tile_b=1024):
    """embedding: [B, E] (bf16 preferred, f32 accepted) -- the output of
       policy.sequential_embedding(states).
       params: dict with w1..w4 / b1..b4; w1..w3 are [E, E] (x @ W convention),
       w4 is [E, 1], biases b1..b3 are [1, E], b4 is [1, 1]."""
    B, e = embedding.shape
    assert e == E
    assert tile_b % 8 == 0, "tile_b must be a multiple of 8 (sublane constraint)"

    # Batch tile: as large as possible (amortize grid-step overhead) but capped
    # so the grid has >= 2 steps whenever B allows it, keeping both v7x
    # TensorCores (and v5e/v6e megacore) fed through the "parallel" axis.
    tb = max(8, min(tile_b, _round_up(pl.cdiv(B, 2), 8)))
    num_tiles = pl.cdiv(B, tb)   # ragged last tile is masked by Pallas (no jnp.pad)

    f32, bf16 = jnp.float32, jnp.bfloat16
    # One-time casts; in production the weights would simply be stored as bf16.
    w1 = params["w1"].astype(bf16)
    w2 = params["w2"].astype(bf16)
    w3 = params["w3"].astype(bf16)
    w4 = params["w4"].reshape(1, E).astype(bf16)     # [E,1] -> lane-dense [1,E] row
    b1 = params["b1"].astype(f32)
    b2 = params["b2"].astype(f32)
    b3 = params["b3"].astype(f32)
    b4 = params["b4"].reshape(1).astype(f32)         # scalar, goes to SMEM

    def full2d(shape):
        # Constant index_map -> operand is DMA'd once and stays VMEM-resident.
        return pl.BlockSpec(shape, lambda i: (0, 0))

    out = pl.pallas_call(
        _value_head_kernel,
        out_shape=jax.ShapeDtypeStruct((num_tiles, 1, tb), f32),
        grid=(num_tiles,),
        in_specs=[
            pl.BlockSpec((tb, E), lambda i: (i, 0)),   # embedding tile (pipelined)
            full2d((E, E)), full2d((1, E)),            # L1 (resident)
            full2d((E, E)), full2d((1, E)),            # L2
            full2d((E, E)), full2d((1, E)),            # L3
            full2d((1, E)),                            # L4 weight row
            pl.BlockSpec(memory_space=pltpu.MemorySpace.SMEM),  # L4 bias scalar
        ],
        out_specs=pl.BlockSpec((1, 1, tb), lambda i: (i, 0, 0)),
        compiler_params=pltpu.CompilerParams(
            dimension_semantics=("parallel",),          # batch grid: megacore / v7x 2-TC
            vmem_limit_bytes=32 * 1024 * 1024,          # v7x-safe headroom
        ),
    )(embedding, w1, b1, w2, b2, w3, b3, w4, b4)

    # [num_tiles, 1, tb] lane-dense rows -> [B, 1]; padded tail rows of the last
    # (ragged) tile are sliced off here and must never be consumed downstream.
    return out.reshape(num_tiles * tb, 1)[:B]


def init_params(key):
    """Deterministic init mirroring nn.Linear: weight [out,in] ~ U(-k,k), bias ~ U(-k,k).
       Stored transposed ([in,out]) for the x @ W convention."""
    ks = jax.random.split(key, 8)

    def linear(kw, kb, fan_in, fan_out):
        k = 1.0 / jnp.sqrt(fan_in)
        w = jax.random.uniform(kw, (fan_out, fan_in), jnp.float32, -k, k).T  # -> [in,out]
        b = jax.random.uniform(kb, (1, fan_out), jnp.float32, -k, k)
        return w, b

    w1, b1 = linear(ks[0], ks[1], E, E)
    w2, b2 = linear(ks[2], ks[3], E, E)
    w3, b3 = linear(ks[4], ks[5], E, 1)[0:0] or linear(ks[4], ks[5], E, E)
    w4, b4 = linear(ks[6], ks[7], E, 1)
    return dict(w1=w1, b1=b1, w2=w2, b2=b2, w3=w3, b3=b3, w4=w4, b4=b4)


def reference(embedding, p):
    x = embedding.astype(jnp.float32)
    h = jnp.maximum(x @ p["w1"] + p["b1"], 0.0)
    h = jnp.maximum(h @ p["w2"] + p["b2"], 0.0)
    h = jnp.maximum(h @ p["w3"] + p["b3"], 0.0)
    return jax.nn.sigmoid(h @ p["w4"] + p["b4"])


if __name__ == "__main__":
    key = jax.random.PRNGKey(0)
    k_emb, k_par = jax.random.split(key)
    params = init_params(k_par)

    # Stand-in for policy.sequential_embedding(states): deterministic [B, E]
    # embeddings, emitted in bf16 (as the real embedding epilogue would).
    # Case 1: tiny batch (tile clamps to 8, single grid step).
    B1 = 8
    emb1 = jax.random.normal(k_emb, (B1, E), jnp.float32).astype(jnp.bfloat16)
    out1 = jax.block_until_ready(karel_sequential_value(emb1, params))
    ref1 = reference(emb1, params)
    assert out1.shape == (B1, 1)
    assert jnp.allclose(out1, ref1, atol=2e-2, rtol=2e-2), "mismatch vs reference (B=8)"

    # Case 2: ragged batch with default tiling -> tb=16, 2 tiles, partial last tile.
    B2 = 20
    emb2 = jax.random.normal(jax.random.PRNGKey(1), (B2, E), jnp.float32).astype(jnp.bfloat16)
    out2 = jax.block_until_ready(karel_sequential_value(emb2, params))
    ref2 = reference(emb2, params)
    assert out2.shape == (B2, 1)
    assert jnp.allclose(out2, ref2, atol=2e-2, rtol=2e-2), "mismatch vs reference (B=20)"

    # Case 3: small explicit tile -> 3 grid steps with a masked ragged tail
    # (also checks f32 embedding input still works via the in-kernel cast).
    out3 = jax.block_until_ready(
        karel_sequential_value(emb2.astype(jnp.float32), params, tile_b=8))
    assert out3.shape == (B2, 1)
    assert jnp.allclose(out3, ref2, atol=2e-2, rtol=2e-2), "mismatch vs reference (tile_b=8)"

    print("KERNEL_OK")
</pallas_src>

<mosaic_0001>
module attributes {stable_mosaic.version = 11 : i64} {
  func.func @_value_head_kernel(%arg0: i32, %arg1: memref<8x512xbf16, #tpu.memory_space<vmem>>, %arg2: memref<512x512xbf16, #tpu.memory_space<vmem>>, %arg3: memref<1x512xf32, #tpu.memory_space<vmem>>, %arg4: memref<512x512xbf16, #tpu.memory_space<vmem>>, %arg5: memref<1x512xf32, #tpu.memory_space<vmem>>, %arg6: memref<512x512xbf16, #tpu.memory_space<vmem>>, %arg7: memref<1x512xf32, #tpu.memory_space<vmem>>, %arg8: memref<1x512xbf16, #tpu.memory_space<vmem>>, %arg9: memref<1xf32, #tpu.memory_space<smem>>, %arg10: memref<1x1x8xf32, #tpu.memory_space<vmem>>) attributes {dimension_semantics = [#tpu.dimension_semantics<parallel>], iteration_bounds = array<i64: 1>, scalar_prefetch = 0 : i64, scratch_operands = 0 : i64, tpu.core_type = #tpu.core_type<tc>, window_params = [{transform_indices = @transform_0, window_bounds = array<i64: 8, 512>}, {pipeline_mode = #tpu.pipeline_mode<synchronous>, transform_indices = @transform_1, window_bounds = array<i64: 512, 512>}, {pipeline_mode = #tpu.pipeline_mode<synchronous>, transform_indices = @transform_2, window_bounds = array<i64: 1, 512>}, {pipeline_mode = #tpu.pipeline_mode<synchronous>, transform_indices = @transform_3, window_bounds = array<i64: 512, 512>}, {pipeline_mode = #tpu.pipeline_mode<synchronous>, transform_indices = @transform_4, window_bounds = array<i64: 1, 512>}, {pipeline_mode = #tpu.pipeline_mode<synchronous>, transform_indices = @transform_5, window_bounds = array<i64: 512, 512>}, {pipeline_mode = #tpu.pipeline_mode<synchronous>, transform_indices = @transform_6, window_bounds = array<i64: 1, 512>}, {pipeline_mode = #tpu.pipeline_mode<synchronous>, transform_indices = @transform_7, window_bounds = array<i64: 1, 512>}, {transform_indices = @transform_8, window_bounds = array<i64: 1>}, {transform_indices = @transform_9, window_bounds = array<i64: 1, 1, 8>}]} {
    %c0 = arith.constant 0 : index
    %c0_0 = arith.constant 0 : index
    %0 = vector.load %arg1[%c0, %c0_0] : memref<8x512xbf16, #tpu.memory_space<vmem>>, vector<8x512xbf16>
    %c0_1 = arith.constant 0 : index
    %c0_2 = arith.constant 0 : index
    %1 = vector.load %arg2[%c0_1, %c0_2] : memref<512x512xbf16, #tpu.memory_space<vmem>>, vector<512x512xbf16>
    %cst = arith.constant dense<0.000000e+00> : vector<8x512xf32>
    %2 = tpu.matmul %0, %1, %cst {dimension_numbers = #tpu.dot_dimension_numbers<[1], [0], [0], [1], [0, 0, 1, 1], [], []>} : vector<8x512xbf16>, vector<512x512xbf16>, vector<8x512xf32> -> vector<8x512xf32>
    %c0_3 = arith.constant 0 : index
    %c0_4 = arith.constant 0 : index
    %3 = vector.load %arg3[%c0_3, %c0_4] : memref<1x512xf32, #tpu.memory_space<vmem>>, vector<1x512xf32>
    %4 = vector.broadcast %3 : vector<1x512xf32> to vector<8x512xf32>
    %5 = arith.addf %2, %4 : vector<8x512xf32>
    %cst_5 = arith.constant 0.000000e+00 : f32
    %6 = vector.broadcast %cst_5 : f32 to vector<8x512xf32>
    %7 = arith.maximumf %5, %6 : vector<8x512xf32>
    %8 = arith.truncf %7 : vector<8x512xf32> to vector<8x512xbf16>
    %c0_6 = arith.constant 0 : index
    %c0_7 = arith.constant 0 : index
    %9 = vector.load %arg4[%c0_6, %c0_7] : memref<512x512xbf16, #tpu.memory_space<vmem>>, vector<512x512xbf16>
    %cst_8 = arith.constant dense<0.000000e+00> : vector<8x512xf32>
    %10 = tpu.matmul %8, %9, %cst_8 {dimension_numbers = #tpu.dot_dimension_numbers<[1], [0], [0], [1], [0, 0, 1, 1], [], []>} : vector<8x512xbf16>, vector<512x512xbf16>, vector<8x512xf32> -> vector<8x512xf32>
    %c0_9 = arith.constant 0 : index
    %c0_10 = arith.constant 0 : index
    %11 = vector.load %arg5[%c0_9, %c0_10] : memref<1x512xf32, #tpu.memory_space<vmem>>, vector<1x512xf32>
    %12 = vector.broadcast %11 : vector<1x512xf32> to vector<8x512xf32>
    %13 = arith.addf %10, %12 : vector<8x512xf32>
    %cst_11 = arith.constant 0.000000e+00 : f32
    %14 = vector.broadcast %cst_11 : f32 to vector<8x512xf32>
    %15 = arith.maximumf %13, %14 : vector<8x512xf32>
    %16 = arith.truncf %15 : vector<8x512xf32> to vector<8x512xbf16>
    %c0_12 = arith.constant 0 : index
    %c0_13 = arith.constant 0 : index
    %17 = vector.load %arg6[%c0_12, %c0_13] : memref<512x512xbf16, #tpu.memory_space<vmem>>, vector<512x512xbf16>
    %cst_14 = arith.constant dense<0.000000e+00> : vector<8x512xf32>
    %18 = tpu.matmul %16, %17, %cst_14 {dimension_numbers = #tpu.dot_dimension_numbers<[1], [0], [0], [1], [0, 0, 1, 1], [], []>} : vector<8x512xbf16>, vector<512x512xbf16>, vector<8x512xf32> -> vector<8x512xf32>
    %c0_15 = arith.constant 0 : index
    %c0_16 = arith.constant 0 : index
    %19 = vector.load %arg7[%c0_15, %c0_16] : memref<1x512xf32, #tpu.memory_space<vmem>>, vector<1x512xf32>
    %20 = vector.broadcast %19 : vector<1x512xf32> to vector<8x512xf32>
    %21 = arith.addf %18, %20 : vector<8x512xf32>
    %cst_17 = arith.constant 0.000000e+00 : f32
    %22 = vector.broadcast %cst_17 : f32 to vector<8x512xf32>
    %23 = arith.maximumf %21, %22 : vector<8x512xf32>
    %24 = arith.truncf %23 : vector<8x512xf32> to vector<8x512xbf16>
    %c0_18 = arith.constant 0 : index
    %c0_19 = arith.constant 0 : index
    %25 = vector.load %arg8[%c0_18, %c0_19] : memref<1x512xbf16, #tpu.memory_space<vmem>>, vector<1x512xbf16>
    %cst_20 = arith.constant dense<0.000000e+00> : vector<1x8xf32>
    %26 = tpu.matmul %25, %24, %cst_20 {dimension_numbers = #tpu.dot_dimension_numbers<[1], [1], [0], [0], [0, 0, 1, 0], [], []>} : vector<1x512xbf16>, vector<8x512xbf16>, vector<1x8xf32> -> vector<1x8xf32>
    %c0_21 = arith.constant 0 : index
    %27 = memref.load %arg9[%c0_21] : memref<1xf32, #tpu.memory_space<smem>>
    %28 = vector.broadcast %27 : f32 to vector<1x8xf32>
    %29 = arith.addf %26, %28 : vector<1x8xf32>
    %30 = arith.negf %29 : vector<1x8xf32>
    %31 = math.exp %30 : vector<1x8xf32>
    %cst_22 = arith.constant 1.000000e+00 : f32
    %32 = vector.broadcast %cst_22 : f32 to vector<1x8xf32>
    %33 = arith.addf %32, %31 : vector<1x8xf32>
    %34 = arith.divf %32, %33 : vector<1x8xf32>
    %c0_23 = arith.constant 0 : index
    %c0_24 = arith.constant 0 : index
    %c0_25 = arith.constant 0 : index
    %35 = vector.load %arg10[%c0_23, %c0_24, %c0_25] : memref<1x1x8xf32, #tpu.memory_space<vmem>>, vector<1x1x8xf32>
    %36 = vector.shape_cast %35 : vector<1x1x8xf32> to vector<1x8xf32>
    %37 = vector.shape_cast %34 : vector<1x8xf32> to vector<1x1x8xf32>
    tpu.vector_store %arg10[%c0_23, %c0_24, %c0_25], %37 {strides = array<i32>} : memref<1x1x8xf32, #tpu.memory_space<vmem>>, vector<1x1x8xf32>,
    return
  }
  func.func @transform_0(%arg0: i32) -> (i32, i32) {
    %c0_i32 = arith.constant 0 : i32
    %c0_i32_0 = arith.constant 0 : i32
    return %arg0, %c0_i32 : i32, i32
  }
  func.func @transform_1(%arg0: i32) -> (i32, i32) {
    %c0_i32 = arith.constant 0 : i32
    %c0_i32_0 = arith.constant 0 : i32
    %c0_i32_1 = arith.constant 0 : i32
    return %c0_i32, %c0_i32_0 : i32, i32
  }
  func.func @transform_2(%arg0: i32) -> (i32, i32) {
    %c0_i32 = arith.constant 0 : i32
    %c0_i32_0 = arith.constant 0 : i32
    %c0_i32_1 = arith.constant 0 : i32
    return %c0_i32, %c0_i32_0 : i32, i32
  }
  func.func @transform_3(%arg0: i32) -> (i32, i32) {
    %c0_i32 = arith.constant 0 : i32
    %c0_i32_0 = arith.constant 0 : i32
    %c0_i32_1 = arith.constant 0 : i32
    return %c0_i32, %c0_i32_0 : i32, i32
  }
  func.func @transform_4(%arg0: i32) -> (i32, i32) {
    %c0_i32 = arith.constant 0 : i32
    %c0_i32_0 = arith.constant 0 : i32
    %c0_i32_1 = arith.constant 0 : i32
    return %c0_i32, %c0_i32_0 : i32, i32
  }
  func.func @transform_5(%arg0: i32) -> (i32, i32) {
    %c0_i32 = arith.constant 0 : i32
    %c0_i32_0 = arith.constant 0 : i32
    %c0_i32_1 = arith.constant 0 : i32
    return %c0_i32, %c0_i32_0 : i32, i32
  }
  func.func @transform_6(%arg0: i32) -> (i32, i32) {
    %c0_i32 = arith.constant 0 : i32
    %c0_i32_0 = arith.constant 0 : i32
    %c0_i32_1 = arith.constant 0 : i32
    return %c0_i32, %c0_i32_0 : i32, i32
  }
  func.func @transform_7(%arg0: i32) -> (i32, i32) {
    %c0_i32 = arith.constant 0 : i32
    %c0_i32_0 = arith.constant 0 : i32
    %c0_i32_1 = arith.constant 0 : i32
    return %c0_i32, %c0_i32_0 : i32, i32
  }
  func.func @transform_8(%arg0: i32) -> i32 {
    %c0_i32 = arith.constant 0 : i32
    %c0_i32_0 = arith.constant 0 : i32
    return %c0_i32 : i32
  }
  func.func @transform_9(%arg0: i32) -> (i32, i32, i32) {
    %c0_i32 = arith.constant 0 : i32
    %c0_i32_0 = arith.constant 0 : i32
    %c0_i32_1 = arith.constant 0 : i32
    return %arg0, %c0_i32, %c0_i32_0 : i32, i32, i32
  }
}

</mosaic_0001>

<bundles_post_ra>
// kernel: tpu_custom_call.1
= control target key start
LH: loop header
LB: loop body
LE: loop exit
PB: predicated region body
PF: predicated region fallthrough
CT: control target
= control target key end

     0   :  { %15 = vsyncpa [#allocation4], 0  ;;  %s4458_s0 = inlined_call_operand.hbm [shape: bf16[8,512], index: 0, kind: input, shape index: {}]   ;;  %s4459_s1 = inlined_call_operand.hbm [shape: bf16[512,512], index: 1, kind: input, shape index: {}]   ;;  %s4460_s2 = inlined_call_operand.vmem [shape: f32[1,512], index: 2, kind: input, shape index: {}]   ;;  %s4461_s3 = inlined_call_operand.hbm [shape: bf16[512,512], index: 3, kind: input, shape index: {}]   ;;  %s4462_s4 = inlined_call_operand.vmem [shape: f32[1,512], index: 4, kind: input, shape index: {}]   ;;  %s4463_s5 = inlined_call_operand.hbm [shape: bf16[512,512], index: 5, kind: input, shape index: {}]   ;;  %s4464_s6 = inlined_call_operand.vmem [shape: f32[1,512], index: 6, kind: input, shape index: {}]   ;;  %s4465_s7 = inlined_call_operand.vmem [shape: bf16[1,512], index: 7, kind: input, shape index: {}]   ;;  %s4466_s8 = inlined_call_operand.<no memory space> [shape: f32[1], index: 8, kind: input, shape index: {}]   ;;  %s4467_s9 = inlined_call_operand.hbm [shape: f32[1,1,8], index: 9, kind: output, shape index: {}]  }
   0x1   :  { %16 = vsyncpa [#allocation7], 0 }
   0x2   :  { %17 = vsyncpa [#allocation10], 0 }
   0x3   :  { %18 = vsyncpa [#allocation5], 0  ;;  %s4265_s30 = smov [#allocation6]   ;;  %s4147_s13 = scalar_lea.hbm %s4459_s1, 16384 }
   0x4   :  { %s34_s10 = sshll.u32 %s4265_s30, 4  ;;  %p4148_p0 = scmp.ne.s32.totalorder %s4459_s1, %s4147_s13  ;;  %s35_s10 = int_to_ptr.vmem [resolvable:$true] %s34_s10 }
   0x5   :  { %p4151_p1 = scmp.lt.u32.totalorder %s4147_s13, %s4459_s1 }
   0x7   :  { %p4153_p2 = pnand %p4151_p1, %p4148_p0 }
   0x9   :  { %4156 = shalt.err (!%p4153_p2)
}
   0xa   :  { %s4157_s18 = scalar_lea.vmem %s35_s10, 16384  ;;  %p4162_p4 = scmp.lt.s32.totalorder %s35_s10, %s35_s10 }
   0xb   :  { %p4158_p3 = scmp.ne.s32.totalorder %s35_s10, %s4157_s18  ;;  %p4163_p5 = scmp.lt.s32.totalorder %s4157_s18, %s4157_s18 }
   0xd   :  { %p4164_p6 = por %p4163_p5, %p4162_p4 }
   0xf   :  { %p4165_p7 = pnand %p4164_p6, %p4158_p3 }
  0x11   :  { %4168 = shalt.err (!%p4165_p7)
}
  0x12   :  { %s4266_s19 = smov 256   ;;  %s4267_s20 = smov 16  }
  0x13   :  { %40 = dma.hbm_to_vmem [thread:$0]  %s4459_s1, 16384, %s35_s10, [#allocation7], %s4266_s19, %s4266_s19, %s4267_s20  }
  0x14   :  { %s4268_s23 = smov [#allocation3]   ;;  %s4269_s25 = smov [#allocation8]  }
  0x15   :  { %s25_s24 = sshll.u32 %s4268_s23, 4  ;;  %s48_s26 = sshll.u32 %s4269_s25, 4  ;;  %s26_s24 = int_to_ptr.vmem [resolvable:$true] %s25_s24  ;;  %s49_s26 = int_to_ptr.vmem [resolvable:$true] %s48_s26 }
  0x16   :  { %s4169_s29 = scalar_lea.hbm %s4458_s0, 256 }
  0x17   :  { %p4170_p8 = scmp.ne.s32.totalorder %s4458_s0, %s4169_s29  ;;  %p4173_p9 = scmp.lt.u32.totalorder %s4169_s29, %s4458_s0 }
  0x19   :  { %p4175_p10 = pnand %p4173_p9, %p4170_p8 }
  0x1b   :  { %4178 = shalt.err (!%p4175_p10)
}
  0x1c   :  { %s4179_s1 = scalar_lea.vmem %s26_s24, 256  ;;  %p4184_p12 = scmp.lt.s32.totalorder %s26_s24, %s26_s24 }
  0x1d   :  { %p4180_p11 = scmp.ne.s32.totalorder %s26_s24, %s4179_s1  ;;  %p4185_p13 = scmp.lt.s32.totalorder %s4179_s1, %s4179_s1 }
  0x1f   :  { %p4186_p0 = por %p4185_p13, %p4184_p12 }
  0x21   :  { %p4187_p1 = pnand %p4186_p0, %p4180_p11 }
  0x23   :  { %4190 = shalt.err (!%p4187_p1)
}
  0x24   :  { %28 = dma.hbm_to_vmem [thread:$0]  %s4458_s0, 256, %s26_s24, [#allocation4]  }
  0x25   :  { %s4191_s17 = scalar_lea.hbm %s4461_s3, 16384 }
  0x26   :  { %p4192_p2 = scmp.ne.s32.totalorder %s4461_s3, %s4191_s17  ;;  %p4195_p3 = scmp.lt.u32.totalorder %s4191_s17, %s4461_s3 }
  0x28   :  { %p4197_p4 = pnand %p4195_p3, %p4192_p2 }
  0x2a   :  { %4200 = shalt.err (!%p4197_p4)
}
  0x2b   :  { %s4201_s25 = scalar_lea.vmem %s49_s26, 16384  ;;  %p4206_p6 = scmp.lt.s32.totalorder %s49_s26, %s49_s26 }
  0x2c   :  { %p4202_p5 = scmp.ne.s32.totalorder %s49_s26, %s4201_s25  ;;  %p4207_p7 = scmp.lt.s32.totalorder %s4201_s25, %s4201_s25 }
  0x2e   :  { %p4208_p8 = por %p4207_p7, %p4206_p6 }
  0x30   :  { %p4209_p9 = pnand %p4208_p8, %p4202_p5 }
  0x32   :  { %4212 = shalt.err (!%p4209_p9)
}
  0x33   :  { %54 = dma.hbm_to_vmem [thread:$0]  %s4461_s3, 16384, %s49_s26, [#allocation7], %s4266_s19, %s4266_s19, %s4267_s20  }
  0x34   :  { %s4270_s27 = smov [#allocation9]   ;;  %s4213_s11 = scalar_lea.hbm %s4463_s5, 16384 }
  0x35   :  { %s62_s28 = sshll.u32 %s4270_s27, 4  ;;  %p4214_p10 = scmp.ne.s32.totalorder %s4463_s5, %s4213_s11  ;;  %s63_s28 = int_to_ptr.vmem [resolvable:$true] %s62_s28 }
  0x36   :  { %p4217_p11 = scmp.lt.u32.totalorder %s4213_s11, %s4463_s5 }
  0x38   :  { %p4219_p12 = pnand %p4217_p11, %p4214_p10 }
  0x3a   :  { %4222 = shalt.err (!%p4219_p12)
}
  0x3b   :  { %s4223_s14 = scalar_lea.vmem %s63_s28, 16384  ;;  %p4228_p0 = scmp.lt.s32.totalorder %s63_s28, %s63_s28 }
  0x3c   :  { %p4224_p13 = scmp.ne.s32.totalorder %s63_s28, %s4223_s14  ;;  %p4229_p1 = scmp.lt.s32.totalorder %s4223_s14, %s4223_s14 }
  0x3e   :  { %p4230_p2 = por %p4229_p1, %p4228_p0 }
  0x40   :  { %p4231_p3 = pnand %p4230_p2, %p4224_p13 }
  0x42   :  { %4234 = shalt.err (!%p4231_p3)
}
  0x43   :  { %68 = dma.hbm_to_vmem [thread:$0]  %s4463_s5, 16384, %s63_s28, [#allocation10], %s4266_s19, %s4266_s19, %s4267_s20  }
  0x44   :  { %4257 = dma.done.wait [#allocation4], 256  }
  0x45   :  { %4258 = vsyncadd [#allocation4], 4294967040 }
  0x46   :  { %4259 = dma.done.wait [#allocation7], 32768  }
  0x47   :  { %4260 = vsyncadd [#allocation7], 4294934528 }
  0x48   :  { %4261 = dma.done.wait [#allocation10], 16384  }
  0x49   :  { %4262 = vsyncadd [#allocation10], 4294950912  ;;  %v3563_v0 = vld [vmem:[#allocation6 + $0x4] ss:$16 sps:$4 sm:$0xff]   ;;  %v3565_v1 = vld [vmem:[#allocation6 + $0xc] ss:$16 sps:$4 sm:$0xff]  }
  0x4a   :  { %894 = vmatprep.subr.bf16.mxu0 %v3563_v0  ;;  %v3567_v2 = vld [vmem:[#allocation6] ss:$16 sps:$4 sm:$0xff]   ;;  %v3568_v3 = vld [vmem:[#allocation6 + $0x8] ss:$16 sps:$4 sm:$0xff]   ;;  %976 = vmatprep.subr.bf16.mxu1 %v3565_v1  ;;  %v3569_v4 = vld [vmem:[#allocation6 + $0x24] ss:$16 sps:$4 sm:$0xff]  }
  0x4b   :  { %895 = vmatpush1.bf16.msra.mxu0 %v3567_v2  ;;  %977 = vmatpush1.bf16.msra.mxu1 %v3568_v3  ;;  %v3571_v5 = vld [vmem:[#allocation6 + $0x2c] ss:$16 sps:$4 sm:$0xff]   ;;  %v3573_v6 = vld [vmem:[#allocation6 + $0x20] ss:$16 sps:$4 sm:$0xff]   ;;  %v3574_v7 = vld [vmem:[#allocation6 + $0x28] ss:$16 sps:$4 sm:$0xff]  }
  0x4c   :  { %896 = vmatprep.subr.bf16.mxu0 %v3569_v4  ;;  %978 = vmatprep.subr.bf16.mxu1 %v3571_v5  ;;  %v3575_v8 = vld [vmem:[#allocation6 + $0x44] ss:$16 sps:$4 sm:$0xff]   ;;  %v3577_v9 = vld [vmem:[#allocation6 + $0x4c] ss:$16 sps:$4 sm:$0xff]   ;;  %v3579_v10 = vld [vmem:[#allocation6 + $0x40] ss:$16 sps:$4 sm:$0xff]  }
  0x4d   :  { %v3580_v11 = vld [vmem:[#allocation6 + $0x48] ss:$16 sps:$4 sm:$0xff]   ;;  %v3581_v12 = vld [vmem:[#allocation6 + $0x64] ss:$16 sps:$4 sm:$0xff]   ;;  %v3583_v13 = vld [vmem:[#allocation6 + $0x6c] ss:$16 sps:$4 sm:$0xff]  }
  0x4e   :  { %v3585_v14 = vld [vmem:[#allocation6 + $0x60] ss:$16 sps:$4 sm:$0xff]   ;;  %v3586_v15 = vld [vmem:[#allocation6 + $0x68] ss:$16 sps:$4 sm:$0xff]   ;;  %v3587_v16 = vld [vmem:[#allocation6 + $0x84] ss:$16 sps:$4 sm:$0xff]  }
  0x4f   :  { %897 = vmatpush1.bf16.msra.mxu0 %v3573_v6  ;;  %979 = vmatpush1.bf16.msra.mxu1 %v3574_v7  ;;  %v3589_v17 = vld [vmem:[#allocation6 + $0x8c] ss:$16 sps:$4 sm:$0xff]   ;;  %v3591_v18 = vld [vmem:[#allocation6 + $0x80] ss:$16 sps:$4 sm:$0xff]   ;;  %v3592_v19 = vld [vmem:[#allocation6 + $0x88] ss:$16 sps:$4 sm:$0xff]  }
  0x50   :  { %898 = vmatprep.subr.bf16.mxu0 %v3575_v8  ;;  %980 = vmatprep.subr.bf16.mxu1 %v3577_v9  ;;  %v3593_v20 = vld [vmem:[#allocation6 + $0xa4] ss:$16 sps:$4 sm:$0xff]   ;;  %v3595_v21 = vld [vmem:[#allocation6 + $0xac] ss:$16 sps:$4 sm:$0xff]   ;;  %v3597_v22 = vld [vmem:[#allocation6 + $0xa0] ss:$16 sps:$4 sm:$0xff]  }
  0x51   :  { %v3598_v23 = vld [vmem:[#allocation6 + $0xa8] ss:$16 sps:$4 sm:$0xff]   ;;  %v3599_v24 = vld [vmem:[#allocation6 + $0xc4] ss:$16 sps:$4 sm:$0xff]   ;;  %v3601_v25 = vld [vmem:[#allocation6 + $0xcc] ss:$16 sps:$4 sm:$0xff]  }
  0x52   :  { %v3603_v26 = vld [vmem:[#allocation6 + $0xc0] ss:$16 sps:$4 sm:$0xff]   ;;  %v3604_v27 = vld [vmem:[#allocation6 + $0xc8] ss:$16 sps:$4 sm:$0xff]   ;;  %v3605_v28 = vld [vmem:[#allocation6 + $0xe4] ss:$16 sps:$4 sm:$0xff]  }
  0x53   :  { %899 = vmatpush1.bf16.msra.mxu0 %v3579_v10  ;;  %981 = vmatpush1.bf16.msra.mxu1 %v3580_v11  ;;  %v3607_v29 = vld [vmem:[#allocation6 + $0xec] ss:$16 sps:$4 sm:$0xff]   ;;  %v3609_v30 = vld [vmem:[#allocation6 + $0xe0] ss:$16 sps:$4 sm:$0xff]   ;;  %v3610_v31 = vld [vmem:[#allocation6 + $0xe8] ss:$16 sps:$4 sm:$0xff]  }
  0x54   :  { %900 = vmatprep.subr.bf16.mxu0 %v3581_v12  ;;  %982 = vmatprep.subr.bf16.mxu1 %v3583_v13  ;;  %v3611_v32 = vld [vmem:[#allocation6 + $0x104] ss:$16 sps:$4 sm:$0xff]   ;;  %v3613_v33 = vld [vmem:[#allocation6 + $0x10c] ss:$16 sps:$4 sm:$0xff]   ;;  %v3615_v34 = vld [vmem:[#allocation6 + $0x100] ss:$16 sps:$4 sm:$0xff]  }
  0x55   :  { %v3616_v35 = vld [vmem:[#allocation6 + $0x108] ss:$16 sps:$4 sm:$0xff]   ;;  %v3617_v36 = vld [vmem:[#allocation6 + $0x124] ss:$16 sps:$4 sm:$0xff]   ;;  %v3619_v37 = vld [vmem:[#allocation6 + $0x12c] ss:$16 sps:$4 sm:$0xff]  }
  0x56   :  { %v3621_v38 = vld [vmem:[#allocation6 + $0x120] ss:$16 sps:$4 sm:$0xff]   ;;  %v3622_v39 = vld [vmem:[#allocation6 + $0x128] ss:$16 sps:$4 sm:$0xff]   ;;  %v3623_v40 = vld [vmem:[#allocation6 + $0x144] ss:$16 sps:$4 sm:$0xff]  }
  0x57   :  { %901 = vmatpush1.bf16.msra.mxu0 %v3585_v14  ;;  %983 = vmatpush1.bf16.msra.mxu1 %v3586_v15  ;;  %v3625_v41 = vld [vmem:[#allocation6 + $0x14c] ss:$16 sps:$4 sm:$0xff]   ;;  %v3627_v42 = vld [vmem:[#allocation6 + $0x140] ss:$16 sps:$4 sm:$0xff]   ;;  %v3628_v43 = vld [vmem:[#allocation6 + $0x148] ss:$16 sps:$4 sm:$0xff]  }
  0x58   :  { %902 = vmatprep.subr.bf16.mxu0 %v3587_v16  ;;  %984 = vmatprep.subr.bf16.mxu1 %v3589_v17  ;;  %v3629_v44 = vld [vmem:[#allocation6 + $0x164] ss:$16 sps:$4 sm:$0xff]   ;;  %v3631_v45 = vld [vmem:[#allocation6 + $0x16c] ss:$16 sps:$4 sm:$0xff]   ;;  %v3633_v47 = vld [vmem:[#allocation6 + $0x160] ss:$16 sps:$4 sm:$0xff]  }
  0x59   :  { %v88_v46 = vld [vmem:[#allocation3] sm:$0xff]  ;;  %v3634_v49 = vld [vmem:[#allocation6 + $0x168] ss:$16 sps:$4 sm:$0xff]   ;;  %v3637_v51 = vld [vmem:[#allocation6 + $0x18c] ss:$16 sps:$4 sm:$0xff]   ;;  %s4272_s18 = smov [#allocation11]  }
  0x5a   :  { %v3128_v48 = vcombine.high %v88_v46, %v88_v46  ;;  %v3635_v50 = vld [vmem:[#allocation6 + $0x184] ss:$16 sps:$4 sm:$0xff]   ;;  %v3639_v52 = vld [vmem:[#allocation6 + $0x180] ss:$16 sps:$4 sm:$0xff]   ;;  %v3640_v53 = vld [vmem:[#allocation6 + $0x188] ss:$16 sps:$4 sm:$0xff]   ;;  %v3127_v4 = vcombine.low %v88_v46, %v88_v46 }
  0x5b   :  { %903 = vmatpush1.bf16.msra.mxu0 %v3591_v18  ;;  %985 = vmatpush1.bf16.msra.mxu1 %v3592_v19  ;;  %v3641_v54 = vld [vmem:[#allocation6 + $0x1a4] ss:$16 sps:$4 sm:$0xff]   ;;  %v3643_v55 = vld [vmem:[#allocation6 + $0x1ac] ss:$16 sps:$4 sm:$0xff]   ;;  %v3645_v56 = vld [vmem:[#allocation6 + $0x1a0] ss:$16 sps:$4 sm:$0xff]  }
  0x5c   :  { %904 = vmatprep.subr.bf16.mxu0 %v3593_v20  ;;  %986 = vmatprep.subr.bf16.mxu1 %v3595_v21  ;;  %v3646_v57 = vld [vmem:[#allocation6 + $0x1a8] ss:$16 sps:$4 sm:$0xff]   ;;  %v3647_v58 = vld [vmem:[#allocation6 + $0x1c4] ss:$16 sps:$4 sm:$0xff]   ;;  %v3649_v59 = vld [vmem:[#allocation6 + $0x1cc] ss:$16 sps:$4 sm:$0xff]  }
  0x5d   :  { %926 = vmatprep.mubr.bf16.mxu0 %v3128_v48  ;;  %1008 = vmatprep.mubr.bf16.mxu1 %v3128_v48  ;;  %v3651_v60 = vld [vmem:[#allocation6 + $0x1c0] ss:$16 sps:$4 sm:$0xff]   ;;  %v3652_v61 = vld [vmem:[#allocation6 + $0x1c8] ss:$16 sps:$4 sm:$0xff]   ;;  %v3653_v62 = vld [vmem:[#allocation6 + $0x1e4] ss:$16 sps:$4 sm:$0xff]  }
  0x5e   :  { %v3655_v63 = vld [vmem:[#allocation6 + $0x1ec] ss:$16 sps:$4 sm:$0xff]   ;;  %v3657_v0 = vld [vmem:[#allocation6 + $0x1e0] ss:$16 sps:$4 sm:$0xff]   ;;  %v3658_v1 = vld [vmem:[#allocation6 + $0x1e8] ss:$16 sps:$4 sm:$0xff]  }
  0x5f   :  { %905 = vmatpush1.bf16.msra.mxu0 %v3597_v22  ;;  %987 = vmatpush1.bf16.msra.mxu1 %v3598_v23  ;;  %v3663_v2 = vld [vmem:[#allocation6 + $0x204] ss:$16 sps:$4 sm:$0xff]   ;;  %v3666_v3 = vld [vmem:[#allocation6 + $0x20c] ss:$16 sps:$4 sm:$0xff]   ;;  %v3661_v5 = vld [vmem:[#allocation6 + $0x200] ss:$16 sps:$4 sm:$0xff]  }
  0x60   :  { %906 = vmatprep.subr.bf16.mxu0 %v3599_v24  ;;  %988 = vmatprep.subr.bf16.mxu1 %v3601_v25  ;;  %v3664_v6 = vld [vmem:[#allocation6 + $0x208] ss:$16 sps:$4 sm:$0xff]   ;;  %v3669_v7 = vld [vmem:[#allocation6 + $0x224] ss:$16 sps:$4 sm:$0xff]   ;;  %v3672_v8 = vld [vmem:[#allocation6 + $0x22c] ss:$16 sps:$4 sm:$0xff]  }
  0x61   :  { %v3667_v9 = vld [vmem:[#allocation6 + $0x220] ss:$16 sps:$4 sm:$0xff]   ;;  %v3670_v10 = vld [vmem:[#allocation6 + $0x228] ss:$16 sps:$4 sm:$0xff]   ;;  %v3675_v11 = vld [vmem:[#allocation6 + $0x244] ss:$16 sps:$4 sm:$0xff]  }
  0x62   :  { %v3678_v12 = vld [vmem:[#allocation6 + $0x24c] ss:$16 sps:$4 sm:$0xff]   ;;  %v3673_v13 = vld [vmem:[#allocation6 + $0x240] ss:$16 sps:$4 sm:$0xff]   ;;  %v3676_v14 = vld [vmem:[#allocation6 + $0x248] ss:$16 sps:$4 sm:$0xff]  }
  0x63   :  { %907 = vmatpush1.bf16.msra.mxu0 %v3603_v26  ;;  %989 = vmatpush1.bf16.msra.mxu1 %v3604_v27  ;;  %v3681_v15 = vld [vmem:[#allocation6 + $0x264] ss:$16 sps:$4 sm:$0xff]   ;;  %v3684_v16 = vld [vmem:[#allocation6 + $0x26c] ss:$16 sps:$4 sm:$0xff]   ;;  %v3679_v17 = vld [vmem:[#allocation6 + $0x260] ss:$16 sps:$4 sm:$0xff]  }
  0x64   :  { %908 = vmatprep.subr.bf16.mxu0 %v3605_v28  ;;  %990 = vmatprep.subr.bf16.mxu1 %v3607_v29  ;;  %v3682_v18 = vld [vmem:[#allocation6 + $0x268] ss:$16 sps:$4 sm:$0xff]   ;;  %v3687_v19 = vld [vmem:[#allocation6 + $0x284] ss:$16 sps:$4 sm:$0xff]   ;;  %v3690_v20 = vld [vmem:[#allocation6 + $0x28c] ss:$16 sps:$4 sm:$0xff]  }
  0x65   :  { %v3685_v21 = vld [vmem:[#allocation6 + $0x280] ss:$16 sps:$4 sm:$0xff]   ;;  %v3688_v22 = vld [vmem:[#allocation6 + $0x288] ss:$16 sps:$4 sm:$0xff]   ;;  %v3693_v23 = vld [vmem:[#allocation6 + $0x2a4] ss:$16 sps:$4 sm:$0xff]  }
  0x66   :  { %v3696_v24 = vld [vmem:[#allocation6 + $0x2ac] ss:$16 sps:$4 sm:$0xff]   ;;  %v3691_v25 = vld [vmem:[#allocation6 + $0x2a0] ss:$16 sps:$4 sm:$0xff]   ;;  %v3694_v26 = vld [vmem:[#allocation6 + $0x2a8] ss:$16 sps:$4 sm:$0xff]  }
  0x67   :  { %909 = vmatpush1.bf16.msra.mxu0 %v3609_v30  ;;  %991 = vmatpush1.bf16.msra.mxu1 %v3610_v31  ;;  %v3699_v27 = vld [vmem:[#allocation6 + $0x2c4] ss:$16 sps:$4 sm:$0xff]   ;;  %v3702_v28 = vld [vmem:[#allocation6 + $0x2cc] ss:$16 sps:$4 sm:$0xff]   ;;  %v3697_v31 = vld [vmem:[#allocation6 + $0x2c0] ss:$16 sps:$4 sm:$0xff]  }
  0x68   :  { %910 = vmatprep.subr.bf16.mxu0 %v3611_v32  ;;  %992 = vmatprep.subr.bf16.mxu1 %v3613_v33  ;;  %v4380_v29 = vld [vmem:[#allocation3 + $0x8] sm:$0xff]  ;;  %v3705_v33 = vld [vmem:[#allocation6 + $0x2e4] ss:$16 sps:$4 sm:$0xff]   ;;  %s3116_s21 = sshll.u32 %s4272_s18, 4  ;;  %vm3108_vm0 = vcmask 57344   ;;  %s3117_s21 = int_to_ptr.vmem [resolvable:$true] %s3116_s21 }
  0x69   :  { %v3130_v30 = vcombine.high %v4380_v29, %v4380_v29  ;;  %v3700_v32 = vld [vmem:[#allocation6 + $0x2c8] ss:$16 sps:$4 sm:$0xff]   ;;  %v3726_v46 = vld [vmem:[#allocation6 + $0x34c] ss:$16 sps:$4 sm:$0xff]   ;;  %s4239_s22 = scalar_lea.vmem %s3117_s21, 32  ;;  %p4240_p5 = scmp.lt.s32.totalorder %s3117_s21, %s3117_s21 }
  0x6a   :  { %v3724_v48 = vld [vmem:[#allocation6 + $0x348] ss:$16 sps:$4 sm:$0xff]  }
  0x6b   :  { %911 = vmatpush1.bf16.msra.mxu0 %v3615_v34  ;;  %993 = vmatpush1.bf16.msra.mxu1 %v3616_v35  ;;  %v3708_v34 = vld [vmem:[#allocation6 + $0x2ec] ss:$16 sps:$4 sm:$0xff]   ;;  %v3703_v35 = vld [vmem:[#allocation6 + $0x2e0] ss:$16 sps:$4 sm:$0xff]  }
  0x6c   :  { %912 = vmatprep.subr.bf16.mxu0 %v3617_v36  ;;  %994 = vmatprep.subr.bf16.mxu1 %v3619_v37  ;;  %v3706_v36 = vld [vmem:[#allocation6 + $0x2e8] ss:$16 sps:$4 sm:$0xff]   ;;  %v3711_v37 = vld [vmem:[#allocation6 + $0x304] ss:$16 sps:$4 sm:$0xff]  }
  0x6f   :  { %913 = vmatpush1.bf16.msra.mxu0 %v3621_v38  ;;  %995 = vmatpush1.bf16.msra.mxu1 %v3622_v39  ;;  %v3714_v38 = vld [vmem:[#allocation6 + $0x30c] ss:$16 sps:$4 sm:$0xff]   ;;  %v3709_v39 = vld [vmem:[#allocation6 + $0x300] ss:$16 sps:$4 sm:$0xff]  }
  0x70   :  { %914 = vmatprep.subr.bf16.mxu0 %v3623_v40  ;;  %996 = vmatprep.subr.bf16.mxu1 %v3625_v41  ;;  %v3712_v40 = vld [vmem:[#allocation6 + $0x308] ss:$16 sps:$4 sm:$0xff]   ;;  %v3717_v41 = vld [vmem:[#allocation6 + $0x324] ss:$16 sps:$4 sm:$0xff]  }
  0x73   :  { %915 = vmatpush1.bf16.msra.mxu0 %v3627_v42  ;;  %997 = vmatpush1.bf16.msra.mxu1 %v3628_v43  ;;  %v3720_v42 = vld [vmem:[#allocation6 + $0x32c] ss:$16 sps:$4 sm:$0xff]   ;;  %v3715_v43 = vld [vmem:[#allocation6 + $0x320] ss:$16 sps:$4 sm:$0xff]  }
  0x74   :  { %916 = vmatprep.subr.bf16.mxu0 %v3629_v44  ;;  %998 = vmatprep.subr.bf16.mxu1 %v3631_v45  ;;  %v3718_v44 = vld [vmem:[#allocation6 + $0x328] ss:$16 sps:$4 sm:$0xff]   ;;  %v3723_v45 = vld [vmem:[#allocation6 + $0x344] ss:$16 sps:$4 sm:$0xff]  }
  0x77   :  { %917 = vmatpush1.bf16.msra.mxu0 %v3633_v47  ;;  %999 = vmatpush1.bf16.msra.mxu1 %v3634_v49  ;;  %v3721_v47 = vld [vmem:[#allocation6 + $0x340] ss:$16 sps:$4 sm:$0xff]   ;;  %v3729_v49 = vld [vmem:[#allocation6 + $0x364] ss:$16 sps:$4 sm:$0xff]  }
  0x78   :  { %918 = vmatprep.subr.bf16.mxu0 %v3635_v50  ;;  %1000 = vmatprep.subr.bf16.mxu1 %v3637_v51  ;;  %v3732_v50 = vld [vmem:[#allocation6 + $0x36c] ss:$16 sps:$4 sm:$0xff]   ;;  %v3727_v51 = vld [vmem:[#allocation6 + $0x360] ss:$16 sps:$4 sm:$0xff]  }
  0x7b   :  { %919 = vmatpush1.bf16.msra.mxu0 %v3639_v52  ;;  %1001 = vmatpush1.bf16.msra.mxu1 %v3640_v53  ;;  %v3730_v52 = vld [vmem:[#allocation6 + $0x368] ss:$16 sps:$4 sm:$0xff]   ;;  %v3735_v53 = vld [vmem:[#allocation6 + $0x384] ss:$16 sps:$4 sm:$0xff]  }
  0x7c   :  { %920 = vmatprep.subr.bf16.mxu0 %v3641_v54  ;;  %1002 = vmatprep.subr.bf16.mxu1 %v3643_v55  ;;  %v3738_v54 = vld [vmem:[#allocation6 + $0x38c] ss:$16 sps:$4 sm:$0xff]   ;;  %v3733_v55 = vld [vmem:[#allocation6 + $0x380] ss:$16 sps:$4 sm:$0xff]  }
  0x7f   :  { %921 = vmatpush1.bf16.msra.mxu0 %v3645_v56  ;;  %1003 = vmatpush1.bf16.msra.mxu1 %v3646_v57  ;;  %v3736_v56 = vld [vmem:[#allocation6 + $0x388] ss:$16 sps:$4 sm:$0xff]   ;;  %v3741_v57 = vld [vmem:[#allocation6 + $0x3a4] ss:$16 sps:$4 sm:$0xff]  }
  0x80   :  { %922 = vmatprep.subr.bf16.mxu0 %v3647_v58  ;;  %1004 = vmatprep.subr.bf16.mxu1 %v3649_v59  ;;  %v3744_v58 = vld [vmem:[#allocation6 + $0x3ac] ss:$16 sps:$4 sm:$0xff]   ;;  %v3739_v59 = vld [vmem:[#allocation6 + $0x3a0] ss:$16 sps:$4 sm:$0xff]  }
  0x83   :  { %923 = vmatpush1.bf16.msra.mxu0 %v3651_v60  ;;  %1005 = vmatpush1.bf16.msra.mxu1 %v3652_v61  ;;  %v3742_v60 = vld [vmem:[#allocation6 + $0x3a8] ss:$16 sps:$4 sm:$0xff]   ;;  %v3747_v61 = vld [vmem:[#allocation6 + $0x3c4] ss:$16 sps:$4 sm:$0xff]  }
  0x84   :  { %924 = vmatprep.subr.bf16.mxu0 %v3653_v62  ;;  %1006 = vmatprep.subr.bf16.mxu1 %v3655_v63  ;;  %v3750_v62 = vld [vmem:[#allocation6 + $0x3cc] ss:$16 sps:$4 sm:$0xff]   ;;  %v3745_v63 = vld [vmem:[#allocation6 + $0x3c0] ss:$16 sps:$4 sm:$0xff]  }
  0x87   :  { %925 = vmatpush1.bf16.msra.mxu0 %v3657_v0  ;;  %1007 = vmatpush1.bf16.msra.mxu1 %v3658_v1  ;;  %v3748_v0 = vld [vmem:[#allocation6 + $0x3c8] ss:$16 sps:$4 sm:$0xff]   ;;  %v3753_v1 = vld [vmem:[#allocation6 + $0x3e4] ss:$16 sps:$4 sm:$0xff]  }
  0x88   :  { %935 = vmatprep.subr.bf16.mxu0 %v3663_v2  ;;  %1017 = vmatprep.subr.bf16.mxu1 %v3666_v3  ;;  %v3756_v2 = vld [vmem:[#allocation6 + $0x3ec] ss:$16 sps:$4 sm:$0xff]   ;;  %v3751_v3 = vld [vmem:[#allocation6 + $0x3e0] ss:$16 sps:$4 sm:$0xff]  }
  0x8a   :  { %927 = vmatmul.mubr.bf16.vlgmr.msra.gmra.mrb[0].mxu0 %v3127_v4  ;;  %1009 = vmatmul.mubr.bf16.vlgmr.msra.gmra.mrb[0].mxu1 %v3127_v4  ;;  %v3754_v4 = vld [vmem:[#allocation6 + $0x3e8] ss:$16 sps:$4 sm:$0xff]  }
  0x8b   :  { %936 = vmatpush1.bf16.msra.mxu0 %v3661_v5  ;;  %1018 = vmatpush1.bf16.msra.mxu1 %v3664_v6  ;;  %v3761_v5 = vld [vmem:[#allocation8 + $0x4] ss:$16 sps:$4 sm:$0xff]   ;;  %v3764_v6 = vld [vmem:[#allocation8 + $0xc] ss:$16 sps:$4 sm:$0xff]  }
  0x8c   :  { %937 = vmatprep.subr.bf16.mxu0 %v3669_v7  ;;  %1019 = vmatprep.subr.bf16.mxu1 %v3672_v8  ;;  %v3759_v7 = vld [vmem:[#allocation8] ss:$16 sps:$4 sm:$0xff]   ;;  %v3762_v8 = vld [vmem:[#allocation8 + $0x8] ss:$16 sps:$4 sm:$0xff]  }
  0x8d   :  { %967 = vmatprep.mubr.bf16.mxu0 %v3130_v30  ;;  %1049 = vmatprep.mubr.bf16.mxu1 %v3130_v30  ;;  %v3797_v30 = vld [vmem:[#allocation8 + $0xc4] ss:$16 sps:$4 sm:$0xff]  }
  0x8f   :  { %938 = vmatpush1.bf16.msra.mxu0 %v3667_v9  ;;  %1020 = vmatpush1.bf16.msra.mxu1 %v3670_v10  ;;  %v3129_v9 = vcombine.low %v4380_v29, %v4380_v29  ;;  %v3767_v10 = vld [vmem:[#allocation8 + $0x24] ss:$16 sps:$4 sm:$0xff]   ;;  %v3792_v29 = vld [vmem:[#allocation8 + $0xa8] ss:$16 sps:$4 sm:$0xff]  }
  0x90   :  { %939 = vmatprep.subr.bf16.mxu0 %v3675_v11  ;;  %1021 = vmatprep.subr.bf16.mxu1 %v3678_v12  ;;  %v3770_v11 = vld [vmem:[#allocation8 + $0x2c] ss:$16 sps:$4 sm:$0xff]   ;;  %v3765_v12 = vld [vmem:[#allocation8 + $0x20] ss:$16 sps:$4 sm:$0xff]  }
  0x93   :  { %940 = vmatpush1.bf16.msra.mxu0 %v3673_v13  ;;  %1022 = vmatpush1.bf16.msra.mxu1 %v3676_v14  ;;  %v3768_v13 = vld [vmem:[#allocation8 + $0x28] ss:$16 sps:$4 sm:$0xff]   ;;  %v3773_v14 = vld [vmem:[#allocation8 + $0x44] ss:$16 sps:$4 sm:$0xff]  }
  0x94   :  { %941 = vmatprep.subr.bf16.mxu0 %v3681_v15  ;;  %1023 = vmatprep.subr.bf16.mxu1 %v3684_v16  ;;  %v3776_v15 = vld [vmem:[#allocation8 + $0x4c] ss:$16 sps:$4 sm:$0xff]   ;;  %v3771_v16 = vld [vmem:[#allocation8 + $0x40] ss:$16 sps:$4 sm:$0xff]  }
  0x97   :  { %942 = vmatpush1.bf16.msra.mxu0 %v3679_v17  ;;  %1024 = vmatpush1.bf16.msra.mxu1 %v3682_v18  ;;  %v3774_v17 = vld [vmem:[#allocation8 + $0x48] ss:$16 sps:$4 sm:$0xff]   ;;  %v3779_v18 = vld [vmem:[#allocation8 + $0x64] ss:$16 sps:$4 sm:$0xff]  }
  0x98   :  { %943 = vmatprep.subr.bf16.mxu0 %v3687_v19  ;;  %1025 = vmatprep.subr.bf16.mxu1 %v3690_v20  ;;  %v3782_v19 = vld [vmem:[#allocation8 + $0x6c] ss:$16 sps:$4 sm:$0xff]   ;;  %v3777_v20 = vld [vmem:[#allocation8 + $0x60] ss:$16 sps:$4 sm:$0xff]  }
  0x9b   :  { %944 = vmatpush1.bf16.msra.mxu0 %v3685_v21  ;;  %1026 = vmatpush1.bf16.msra.mxu1 %v3688_v22  ;;  %v3780_v21 = vld [vmem:[#allocation8 + $0x68] ss:$16 sps:$4 sm:$0xff]   ;;  %v3785_v22 = vld [vmem:[#allocation8 + $0x84] ss:$16 sps:$4 sm:$0xff]  }
  0x9c   :  { %945 = vmatprep.subr.bf16.mxu0 %v3693_v23  ;;  %1027 = vmatprep.subr.bf16.mxu1 %v3696_v24  ;;  %v3788_v23 = vld [vmem:[#allocation8 + $0x8c] ss:$16 sps:$4 sm:$0xff]   ;;  %v3783_v24 = vld [vmem:[#allocation8 + $0x80] ss:$16 sps:$4 sm:$0xff]  }
  0x9f   :  { %946 = vmatpush1.bf16.msra.mxu0 %v3691_v25  ;;  %1028 = vmatpush1.bf16.msra.mxu1 %v3694_v26  ;;  %v3786_v25 = vld [vmem:[#allocation8 + $0x88] ss:$16 sps:$4 sm:$0xff]   ;;  %v3791_v26 = vld [vmem:[#allocation8 + $0xa4] ss:$16 sps:$4 sm:$0xff]  }
  0xa0   :  { %947 = vmatprep.subr.bf16.mxu0 %v3699_v27  ;;  %1029 = vmatprep.subr.bf16.mxu1 %v3702_v28  ;;  %v3794_v27 = vld [vmem:[#allocation8 + $0xac] ss:$16 sps:$4 sm:$0xff]   ;;  %v3789_v28 = vld [vmem:[#allocation8 + $0xa0] ss:$16 sps:$4 sm:$0xff]  }
  0xa3   :  { %948 = vmatpush1.bf16.msra.mxu0 %v3697_v31  ;;  %1030 = vmatpush1.bf16.msra.mxu1 %v3700_v32  ;;  %v3800_v31 = vld [vmem:[#allocation8 + $0xcc] ss:$16 sps:$4 sm:$0xff]   ;;  %v3795_v32 = vld [vmem:[#allocation8 + $0xc0] ss:$16 sps:$4 sm:$0xff]  }
  0xa4   :  { %949 = vmatprep.subr.bf16.mxu0 %v3705_v33  ;;  %1031 = vmatprep.subr.bf16.mxu1 %v3708_v34  ;;  %v3798_v33 = vld [vmem:[#allocation8 + $0xc8] ss:$16 sps:$4 sm:$0xff]   ;;  %v3803_v34 = vld [vmem:[#allocation8 + $0xe4] ss:$16 sps:$4 sm:$0xff]  }
  0xa7   :  { %950 = vmatpush1.bf16.msra.mxu0 %v3703_v35  ;;  %1032 = vmatpush1.bf16.msra.mxu1 %v3706_v36  ;;  %v3806_v35 = vld [vmem:[#allocation8 + $0xec] ss:$16 sps:$4 sm:$0xff]   ;;  %v3801_v36 = vld [vmem:[#allocation8 + $0xe0] ss:$16 sps:$4 sm:$0xff]  }
  0xa8   :  { %951 = vmatprep.subr.bf16.mxu0 %v3711_v37  ;;  %1033 = vmatprep.subr.bf16.mxu1 %v3714_v38  ;;  %v3804_v37 = vld [vmem:[#allocation8 + $0xe8] ss:$16 sps:$4 sm:$0xff]   ;;  %v3809_v38 = vld [vmem:[#allocation8 + $0x104] ss:$16 sps:$4 sm:$0xff]  }
  0xab   :  { %952 = vmatpush1.bf16.msra.mxu0 %v3709_v39  ;;  %1034 = vmatpush1.bf16.msra.mxu1 %v3712_v40  ;;  %v3812_v39 = vld [vmem:[#allocation8 + $0x10c] ss:$16 sps:$4 sm:$0xff]   ;;  %v3807_v40 = vld [vmem:[#allocation8 + $0x100] ss:$16 sps:$4 sm:$0xff]  }
  0xac   :  { %953 = vmatprep.subr.bf16.mxu0 %v3717_v41  ;;  %1035 = vmatprep.subr.bf16.mxu1 %v3720_v42  ;;  %v3810_v41 = vld [vmem:[#allocation8 + $0x108] ss:$16 sps:$4 sm:$0xff]   ;;  %v3815_v42 = vld [vmem:[#allocation8 + $0x124] ss:$16 sps:$4 sm:$0xff]  }
  0xaf   :  { %954 = vmatpush1.bf16.msra.mxu0 %v3715_v43  ;;  %1036 = vmatpush1.bf16.msra.mxu1 %v3718_v44  ;;  %v3818_v43 = vld [vmem:[#allocation8 + $0x12c] ss:$16 sps:$4 sm:$0xff]   ;;  %v3813_v44 = vld [vmem:[#allocation8 + $0x120] ss:$16 sps:$4 sm:$0xff]  }
  0xb0   :  { %955 = vmatprep.subr.bf16.mxu0 %v3723_v45  ;;  %1037 = vmatprep.subr.bf16.mxu1 %v3726_v46  ;;  %v3816_v45 = vld [vmem:[#allocation8 + $0x128] ss:$16 sps:$4 sm:$0xff]   ;;  %v3821_v46 = vld [vmem:[#allocation8 + $0x144] ss:$16 sps:$4 sm:$0xff]  }
  0xb3   :  { %956 = vmatpush1.bf16.msra.mxu0 %v3721_v47  ;;  %1038 = vmatpush1.bf16.msra.mxu1 %v3724_v48  ;;  %v3824_v47 = vld [vmem:[#allocation8 + $0x14c] ss:$16 sps:$4 sm:$0xff]   ;;  %v3819_v48 = vld [vmem:[#allocation8 + $0x140] ss:$16 sps:$4 sm:$0xff]  }
  0xb4   :  { %957 = vmatprep.subr.bf16.mxu0 %v3729_v49  ;;  %1039 = vmatprep.subr.bf16.mxu1 %v3732_v50  ;;  %v3822_v49 = vld [vmem:[#allocation8 + $0x148] ss:$16 sps:$4 sm:$0xff]   ;;  %v3827_v50 = vld [vmem:[#allocation8 + $0x164] ss:$16 sps:$4 sm:$0xff]  }
  0xb7   :  { %958 = vmatpush1.bf16.msra.mxu0 %v3727_v51  ;;  %1040 = vmatpush1.bf16.msra.mxu1 %v3730_v52  ;;  %v3830_v51 = vld [vmem:[#allocation8 + $0x16c] ss:$16 sps:$4 sm:$0xff]   ;;  %v3825_v52 = vld [vmem:[#allocation8 + $0x160] ss:$16 sps:$4 sm:$0xff]  }
  0xb8   :  { %959 = vmatprep.subr.bf16.mxu0 %v3735_v53  ;;  %1041 = vmatprep.subr.bf16.mxu1 %v3738_v54  ;;  %v3828_v53 = vld [vmem:[#allocation8 + $0x168] ss:$16 sps:$4 sm:$0xff]   ;;  %v3833_v54 = vld [vmem:[#allocation8 + $0x184] ss:$16 sps:$4 sm:$0xff]  }
  0xbb   :  { %960 = vmatpush1.bf16.msra.mxu0 %v3733_v55  ;;  %1042 = vmatpush1.bf16.msra.mxu1 %v3736_v56  ;;  %v3836_v55 = vld [vmem:[#allocation8 + $0x18c] ss:$16 sps:$4 sm:$0xff]   ;;  %v3831_v56 = vld [vmem:[#allocation8 + $0x180] ss:$16 sps:$4 sm:$0xff]  }
  0xbc   :  { %961 = vmatprep.subr.bf16.mxu0 %v3741_v57  ;;  %1043 = vmatprep.subr.bf16.mxu1 %v3744_v58  ;;  %v3834_v57 = vld [vmem:[#allocation8 + $0x188] ss:$16 sps:$4 sm:$0xff]   ;;  %v3839_v58 = vld [vmem:[#allocation8 + $0x1a4] ss:$16 sps:$4 sm:$0xff]  }
  0xbf   :  { %962 = vmatpush1.bf16.msra.mxu0 %v3739_v59  ;;  %1044 = vmatpush1.bf16.msra.mxu1 %v3742_v60  ;;  %v3842_v59 = vld [vmem:[#allocation8 + $0x1ac] ss:$16 sps:$4 sm:$0xff]   ;;  %v3837_v60 = vld [vmem:[#allocation8 + $0x1a0] ss:$16 sps:$4 sm:$0xff]  }
  0xc0   :  { %963 = vmatprep.subr.bf16.mxu0 %v3747_v61  ;;  %1045 = vmatprep.subr.bf16.mxu1 %v3750_v62  ;;  %v3840_v61 = vld [vmem:[#allocation8 + $0x1a8] ss:$16 sps:$4 sm:$0xff]   ;;  %v3845_v62 = vld [vmem:[#allocation8 + $0x1c4] ss:$16 sps:$4 sm:$0xff]  }
  0xc3   :  { %964 = vmatpush1.bf16.msra.mxu0 %v3745_v63  ;;  %1046 = vmatpush1.bf16.msra.mxu1 %v3748_v0  ;;  %v3848_v63 = vld [vmem:[#allocation8 + $0x1cc] ss:$16 sps:$4 sm:$0xff]   ;;  %v3843_v0 = vld [vmem:[#allocation8 + $0x1c0] ss:$16 sps:$4 sm:$0xff]  }
  0xc4   :  { %965 = vmatprep.subr.bf16.mxu0 %v3753_v1  ;;  %1047 = vmatprep.subr.bf16.mxu1 %v3756_v2  ;;  %v3846_v1 = vld [vmem:[#allocation8 + $0x1c8] ss:$16 sps:$4 sm:$0xff]   ;;  %v3851_v2 = vld [vmem:[#allocation8 + $0x1e4] ss:$16 sps:$4 sm:$0xff]  }
  0xc7   :  { %966 = vmatpush1.bf16.msra.mxu0 %v3751_v3  ;;  %1048 = vmatpush1.bf16.msra.mxu1 %v3754_v4  ;;  %v3854_v3 = vld [vmem:[#allocation8 + $0x1ec] ss:$16 sps:$4 sm:$0xff]   ;;  %v3849_v4 = vld [vmem:[#allocation8 + $0x1e0] ss:$16 sps:$4 sm:$0xff]  }
  0xc8   :  { %1856 = vmatprep.subr.bf16.mxu0 %v3761_v5  ;;  %1938 = vmatprep.subr.bf16.mxu1 %v3764_v6  ;;  %v3852_v5 = vld [vmem:[#allocation8 + $0x1e8] ss:$16 sps:$4 sm:$0xff]   ;;  %v3857_v6 = vld [vmem:[#allocation8 + $0x204] ss:$16 sps:$4 sm:$0xff]  }
  0xca   :  { %968 = vmatmul.mubr.bf16.vlgmr.msra.gmra.mrb[0].mxu0 %v3129_v9  ;;  %1050 = vmatmul.mubr.bf16.vlgmr.msra.gmra.mrb[0].mxu1 %v3129_v9 }
  0xcb   :  { %1857 = vmatpush1.bf16.msra.mxu0 %v3759_v7  ;;  %1939 = vmatpush1.bf16.msra.mxu1 %v3762_v8  ;;  %v3860_v7 = vld [vmem:[#allocation8 + $0x20c] ss:$16 sps:$4 sm:$0xff]   ;;  %v220_v8 = vlaneseq }
  0xcc   :  { %1858 = vmatprep.subr.bf16.mxu0 %v3767_v10  ;;  %1940 = vmatprep.subr.bf16.mxu1 %v3770_v11  ;;  %v4394_v11 = vld [vmem:[%s4460_s2] sm:$0xf] }
  0xcd   :  { %v4386_v9 = vshrl.u32 %v220_v8, 7  ;;  %v3917_v8 = vld [vmem:[#allocation8 + $0x344] ss:$16 sps:$4 sm:$0xff]  }
  0xcf   :  { %1859 = vmatpush1.bf16.msra.mxu0 %v3765_v12  ;;  %1941 = vmatpush1.bf16.msra.mxu1 %v3768_v13  ;;  %v4389_v10 = vsub.s32 0, %v4386_v9  ;;  %v4397_v12 = vsub.s32 1, %v4386_v9  ;;  %v4400_v13 = vsub.s32 3, %v4386_v9 }
  0xd0   :  { %1860 = vmatprep.subr.bf16.mxu0 %v3773_v14  ;;  %1942 = vmatprep.subr.bf16.mxu1 %v3776_v15 }
  0xd1   :  { %v223_v14 = vrot.slane %v4394_v11, %v4389_v10  ;;  %v227_v15 = vrot.slane %v4394_v11, %v4397_v12 }
  0xd3   :  { %1861 = vmatpush1.bf16.msra.mxu0 %v3771_v16  ;;  %1943 = vmatpush1.bf16.msra.mxu1 %v3774_v17  ;;  %v235_v16 = vrot.slane %v4394_v11, %v4400_v13 }
  0xd4   :  { %1862 = vmatprep.subr.bf16.mxu0 %v3779_v18  ;;  %1944 = vmatprep.subr.bf16.mxu1 %v3782_v19 }
  0xd7   :  { %1863 = vmatpush1.bf16.msra.mxu0 %v3777_v20  ;;  %1945 = vmatpush1.bf16.msra.mxu1 %v3780_v21 }
  0xd8   :  { %1864 = vmatprep.subr.bf16.mxu0 %v3785_v22  ;;  %1946 = vmatprep.subr.bf16.mxu1 %v3788_v23 }
  0xdb   :  { %1865 = vmatpush1.bf16.msra.mxu0 %v3783_v24  ;;  %1947 = vmatpush1.bf16.msra.mxu1 %v3786_v25 }
  0xdc   :  { %1866 = vmatprep.subr.bf16.mxu0 %v3791_v26  ;;  %1948 = vmatprep.subr.bf16.mxu1 %v3794_v27 }
  0xdf   :  { %1867 = vmatpush1.bf16.msra.mxu0 %v3789_v28  ;;  %1949 = vmatpush1.bf16.msra.mxu1 %v3792_v29 }
  0xe0   :  { %1868 = vmatprep.subr.bf16.mxu0 %v3797_v30  ;;  %1950 = vmatprep.subr.bf16.mxu1 %v3800_v31 }
  0xe3   :  { %1869 = vmatpush1.bf16.msra.mxu0 %v3795_v32  ;;  %1951 = vmatpush1.bf16.msra.mxu1 %v3798_v33  ;;  %v3855_v32 = vld [vmem:[#allocation8 + $0x200] ss:$16 sps:$4 sm:$0xff]   ;;  %v3858_v33 = vld [vmem:[#allocation8 + $0x208] ss:$16 sps:$4 sm:$0xff]  }
  0xe4   :  { %1870 = vmatprep.subr.bf16.mxu0 %v3803_v34  ;;  %1952 = vmatprep.subr.bf16.mxu1 %v3806_v35  ;;  %v3863_v35 = vld [vmem:[#allocation8 + $0x224] ss:$16 sps:$4 sm:$0xff]  }
  0xe7   :  { %1871 = vmatpush1.bf16.msra.mxu0 %v3801_v36  ;;  %1953 = vmatpush1.bf16.msra.mxu1 %v3804_v37  ;;  %v3866_v36 = vld [vmem:[#allocation8 + $0x22c] ss:$16 sps:$4 sm:$0xff]  }
  0xe8   :  { %1872 = vmatprep.subr.bf16.mxu0 %v3809_v38  ;;  %1954 = vmatprep.subr.bf16.mxu1 %v3812_v39  ;;  %v3861_v38 = vld [vmem:[#allocation8 + $0x220] ss:$16 sps:$4 sm:$0xff]   ;;  %v3864_v39 = vld [vmem:[#allocation8 + $0x228] ss:$16 sps:$4 sm:$0xff]  }
  0xeb   :  { %1873 = vmatpush1.bf16.msra.mxu0 %v3807_v40  ;;  %1955 = vmatpush1.bf16.msra.mxu1 %v3810_v41  ;;  %v3869_v40 = vld [vmem:[#allocation8 + $0x244] ss:$16 sps:$4 sm:$0xff]   ;;  %v3872_v41 = vld [vmem:[#allocation8 + $0x24c] ss:$16 sps:$4 sm:$0xff]  }
  0xec   :  { %1874 = vmatprep.subr.bf16.mxu0 %v3815_v42  ;;  %1956 = vmatprep.subr.bf16.mxu1 %v3818_v43  ;;  %v3867_v42 = vld [vmem:[#allocation8 + $0x240] ss:$16 sps:$4 sm:$0xff]   ;;  %v3870_v43 = vld [vmem:[#allocation8 + $0x248] ss:$16 sps:$4 sm:$0xff]  }
  0xef   :  { %1875 = vmatpush1.bf16.msra.mxu0 %v3813_v44  ;;  %1957 = vmatpush1.bf16.msra.mxu1 %v3816_v45  ;;  %v3875_v44 = vld [vmem:[#allocation8 + $0x264] ss:$16 sps:$4 sm:$0xff]   ;;  %v3878_v45 = vld [vmem:[#allocation8 + $0x26c] ss:$16 sps:$4 sm:$0xff]  }
  0xf0   :  { %1876 = vmatprep.subr.bf16.mxu0 %v3821_v46  ;;  %1958 = vmatprep.subr.bf16.mxu1 %v3824_v47  ;;  %v3873_v46 = vld [vmem:[#allocation8 + $0x260] ss:$16 sps:$4 sm:$0xff]   ;;  %v3876_v47 = vld [vmem:[#allocation8 + $0x268] ss:$16 sps:$4 sm:$0xff]  }
  0xf3   :  { %1877 = vmatpush1.bf16.msra.mxu0 %v3819_v48  ;;  %1959 = vmatpush1.bf16.msra.mxu1 %v3822_v49  ;;  %v3881_v48 = vld [vmem:[#allocation8 + $0x284] ss:$16 sps:$4 sm:$0xff]   ;;  %v3884_v49 = vld [vmem:[#allocation8 + $0x28c] ss:$16 sps:$4 sm:$0xff]  }
  0xf4   :  { %1878 = vmatprep.subr.bf16.mxu0 %v3827_v50  ;;  %1960 = vmatprep.subr.bf16.mxu1 %v3830_v51  ;;  %v3879_v50 = vld [vmem:[#allocation8 + $0x280] ss:$16 sps:$4 sm:$0xff]   ;;  %v3882_v51 = vld [vmem:[#allocation8 + $0x288] ss:$16 sps:$4 sm:$0xff]  }
  0xf7   :  { %1879 = vmatpush1.bf16.msra.mxu0 %v3825_v52  ;;  %1961 = vmatpush1.bf16.msra.mxu1 %v3828_v53  ;;  %v3887_v52 = vld [vmem:[#allocation8 + $0x2a4] ss:$16 sps:$4 sm:$0xff]   ;;  %v3890_v53 = vld [vmem:[#allocation8 + $0x2ac] ss:$16 sps:$4 sm:$0xff]  }
  0xf8   :  { %1880 = vmatprep.subr.bf16.mxu0 %v3833_v54  ;;  %1962 = vmatprep.subr.bf16.mxu1 %v3836_v55  ;;  %v3885_v54 = vld [vmem:[#allocation8 + $0x2a0] ss:$16 sps:$4 sm:$0xff]   ;;  %v3888_v55 = vld [vmem:[#allocation8 + $0x2a8] ss:$16 sps:$4 sm:$0xff]  }
  0xfb   :  { %1881 = vmatpush1.bf16.msra.mxu0 %v3831_v56  ;;  %1963 = vmatpush1.bf16.msra.mxu1 %v3834_v57  ;;  %v3893_v56 = vld [vmem:[#allocation8 + $0x2c4] ss:$16 sps:$4 sm:$0xff]   ;;  %v3896_v57 = vld [vmem:[#allocation8 + $0x2cc] ss:$16 sps:$4 sm:$0xff]  }
  0xfc   :  { %1882 = vmatprep.subr.bf16.mxu0 %v3839_v58  ;;  %1964 = vmatprep.subr.bf16.mxu1 %v3842_v59  ;;  %v3891_v58 = vld [vmem:[#allocation8 + $0x2c0] ss:$16 sps:$4 sm:$0xff]   ;;  %v3894_v59 = vld [vmem:[#allocation8 + $0x2c8] ss:$16 sps:$4 sm:$0xff]  }
  0xff   :  { %1883 = vmatpush1.bf16.msra.mxu0 %v3837_v60  ;;  %1965 = vmatpush1.bf16.msra.mxu1 %v3840_v61  ;;  %v3899_v60 = vld [vmem:[#allocation8 + $0x2e4] ss:$16 sps:$4 sm:$0xff]   ;;  %v3902_v61 = vld [vmem:[#allocation8 + $0x2ec] ss:$16 sps:$4 sm:$0xff]  }
 0x100   :  { %1884 = vmatprep.subr.bf16.mxu0 %v3845_v62  ;;  %1966 = vmatprep.subr.bf16.mxu1 %v3848_v63  ;;  %v3897_v62 = vld [vmem:[#allocation8 + $0x2e0] ss:$16 sps:$4 sm:$0xff]   ;;  %v3900_v63 = vld [vmem:[#allocation8 + $0x2e8] ss:$16 sps:$4 sm:$0xff]  }
 0x103   :  { %1885 = vmatpush1.bf16.msra.mxu0 %v3843_v0  ;;  %1967 = vmatpush1.bf16.msra.mxu1 %v3846_v1  ;;  %v3905_v0 = vld [vmem:[#allocation8 + $0x304] ss:$16 sps:$4 sm:$0xff]   ;;  %v3908_v1 = vld [vmem:[#allocation8 + $0x30c] ss:$16 sps:$4 sm:$0xff]  }
 0x104   :  { %1886 = vmatprep.subr.bf16.mxu0 %v3851_v2  ;;  %1968 = vmatprep.subr.bf16.mxu1 %v3854_v3  ;;  %v3903_v2 = vld [vmem:[#allocation8 + $0x300] ss:$16 sps:$4 sm:$0xff]   ;;  %v3906_v3 = vld [vmem:[#allocation8 + $0x308] ss:$16 sps:$4 sm:$0xff]  }
 0x107   :  { %1887 = vmatpush1.bf16.msra.mxu0 %v3849_v4  ;;  %1969 = vmatpush1.bf16.msra.mxu1 %v3852_v5  ;;  %v3911_v4 = vld [vmem:[#allocation8 + $0x324] ss:$16 sps:$4 sm:$0xff]   ;;  %v3914_v5 = vld [vmem:[#allocation8 + $0x32c] ss:$16 sps:$4 sm:$0xff]  }
 0x108   :  { %1897 = vmatprep.subr.bf16.mxu0 %v3857_v6  ;;  %1979 = vmatprep.subr.bf16.mxu1 %v3860_v7  ;;  %v3909_v6 = vld [vmem:[#allocation8 + $0x320] ss:$16 sps:$4 sm:$0xff]   ;;  %v3912_v7 = vld [vmem:[#allocation8 + $0x328] ss:$16 sps:$4 sm:$0xff]  }
 0x19d   :  { %v969_v17 = vpop.f32.mrb[0].mxu0  ;;  %v4408_v18 = vpop.f32.mrb[0].mxu1 }
 0x19e   :  { %v3517_v19 = vadd.f32 %v969_v17, %v223_v14  ;;  %v971_v20 = vpop.f32.mrb[1].mxu0  ;;  %v1053_v21 = vpop.f32.mrb[1].mxu1  ;;  %v3920_v14 = vld [vmem:[#allocation8 + $0x34c] ss:$16 sps:$4 sm:$0xff]   ;;  %v3923_v17 = vld [vmem:[#allocation8 + $0x364] ss:$16 sps:$4 sm:$0xff]  }
 0x19f   :  { %v3518_v22 = vadd.f32 %v971_v20, %v227_v15  ;;  %v3520_v23 = vadd.f32 %v1053_v21, %v235_v16  ;;  %v973_v24 = vpop.f32.mrb[2].mxu0  ;;  %v1055_v25 = vpop.f32.mrb[2].mxu1  ;;  %v3915_v15 = vld [vmem:[#allocation8 + $0x340] ss:$16 sps:$4 sm:$0xff]   ;;  %v3918_v16 = vld [vmem:[#allocation8 + $0x348] ss:$16 sps:$4 sm:$0xff]  }
 0x1a0   :  { %v1058_v26 = vmax.f32 %v3517_v19, 0.0  ;;  %v974_v27 = vpop.f32.mrb[3].mxu0  ;;  %v1056_v28 = vpop.f32.mrb[3].mxu1  ;;  %v3926_v19 = vld [vmem:[#allocation8 + $0x36c] ss:$16 sps:$4 sm:$0xff]  }
 0x1a1   :  { %v1059_v29 = vmax.f32 %v3518_v22, 0.0  ;;  %v1061_v30 = vmax.f32 %v3520_v23, 0.0  ;;  %v3921_v20 = vld [vmem:[#allocation8 + $0x360] ss:$16 sps:$4 sm:$0xff]   ;;  %v3924_v21 = vld [vmem:[#allocation8 + $0x368] ss:$16 sps:$4 sm:$0xff]  }
 0x1a2   :  { %v1062_v34 = vpack.c.bf16 %v1058_v26, %v1058_v26  ;;  %v3929_v22 = vld [vmem:[#allocation8 + $0x384] ss:$16 sps:$4 sm:$0xff]   ;;  %v3932_v23 = vld [vmem:[#allocation8 + $0x38c] ss:$16 sps:$4 sm:$0xff]   ;;  %v3927_v24 = vld [vmem:[#allocation8 + $0x380] ss:$16 sps:$4 sm:$0xff]  }
 0x1a3   :  { %v1063_v31 = vpack.c.bf16 %v1059_v29, %v1059_v29  ;;  %v1065_v37 = vpack.c.bf16 %v1061_v30, %v1061_v30  ;;  %v3930_v25 = vld [vmem:[#allocation8 + $0x388] ss:$16 sps:$4 sm:$0xff]   ;;  %v4411_v26 = vsub.s32 2, %v4386_v9  ;;  %v3935_v27 = vld [vmem:[#allocation8 + $0x3a4] ss:$16 sps:$4 sm:$0xff]  }
 0x1a4   :  { %v3938_v28 = vld [vmem:[#allocation8 + $0x3ac] ss:$16 sps:$4 sm:$0xff]   ;;  %v3933_v29 = vld [vmem:[#allocation8 + $0x3a0] ss:$16 sps:$4 sm:$0xff]   ;;  %v3936_v30 = vld [vmem:[#allocation8 + $0x3a8] ss:$16 sps:$4 sm:$0xff]  }
 0x1a5   :  { %1888 = vmatprep.mubr.bf16.mxu0 %v1063_v31  ;;  %1970 = vmatprep.mubr.bf16.mxu1 %v1063_v31  ;;  %v231_v31 = vrot.slane %v4394_v11, %v4411_v26  ;;  %v3953_v11 = vld [vmem:[#allocation9 + $0x4] ss:$16 sps:$4 sm:$0xff]  }
 0x1a6   :  { %1889 = vmatmul.mubr.bf16.vlgmr.msra.gmra.mrb[4].mxu0 %v1062_v34  ;;  %1971 = vmatmul.mubr.bf16.vlgmr.msra.gmra.mrb[4].mxu1 %v1062_v34  ;;  %v3939_v34 = vld [vmem:[#allocation8 + $0x3c0] ss:$16 sps:$4 sm:$0xff]  }
 0x1a7   :  { %1898 = vmatpush1.bf16.msra.mxu0 %v3855_v32  ;;  %1980 = vmatpush1.bf16.msra.mxu1 %v3858_v33  ;;  %v3941_v32 = vld [vmem:[#allocation8 + $0x3c4] ss:$16 sps:$4 sm:$0xff]   ;;  %v3944_v33 = vld [vmem:[#allocation8 + $0x3cc] ss:$16 sps:$4 sm:$0xff]  }
 0x1a8   :  { %1929 = vmatprep.mubr.bf16.mxu0 %v1065_v37  ;;  %2011 = vmatprep.mubr.bf16.mxu1 %v1065_v37  ;;  %v3947_v37 = vld [vmem:[#allocation8 + $0x3e4] ss:$16 sps:$4 sm:$0xff]  }
 0x1a9   :  { %1899 = vmatprep.subr.bf16.mxu0 %v3863_v35  ;;  %1981 = vmatprep.subr.bf16.mxu1 %v3866_v36  ;;  %v3942_v35 = vld [vmem:[#allocation8 + $0x3c8] ss:$16 sps:$4 sm:$0xff]   ;;  %v3519_v36 = vadd.f32 %v4408_v18, %v231_v31  ;;  %v3959_v18 = vld [vmem:[#allocation9 + $0x24] ss:$16 sps:$4 sm:$0xff]  }
 0x1aa   :  { %v4020_v31 = vld [vmem:[#allocation9 + $0x168] ss:$16 sps:$4 sm:$0xff]  }
 0x1ab   :  { %1900 = vmatpush1.bf16.msra.mxu0 %v3861_v38  ;;  %1982 = vmatpush1.bf16.msra.mxu1 %v3864_v39  ;;  %v3950_v38 = vld [vmem:[#allocation8 + $0x3ec] ss:$16 sps:$4 sm:$0xff]   ;;  %v3945_v39 = vld [vmem:[#allocation8 + $0x3e0] ss:$16 sps:$4 sm:$0xff]  }
 0x1ac   :  { %1901 = vmatprep.subr.bf16.mxu0 %v3869_v40  ;;  %1983 = vmatprep.subr.bf16.mxu1 %v3872_v41  ;;  %v3948_v40 = vld [vmem:[#allocation8 + $0x3e8] ss:$16 sps:$4 sm:$0xff]   ;;  %v1060_v41 = vmax.f32 %v3519_v36, 0.0  ;;  %v4031_v36 = vld [vmem:[#allocation9 + $0x1a4] ss:$16 sps:$4 sm:$0xff]  }
 0x1af   :  { %1902 = vmatpush1.bf16.msra.mxu0 %v3867_v42  ;;  %1984 = vmatpush1.bf16.msra.mxu1 %v3870_v43  ;;  %v3956_v42 = vld [vmem:[#allocation9 + $0xc] ss:$16 sps:$4 sm:$0xff]   ;;  %v3951_v43 = vld [vmem:[#allocation9] ss:$16 sps:$4 sm:$0xff]  }
 0x1b0   :  { %1903 = vmatprep.subr.bf16.mxu0 %v3875_v44  ;;  %1985 = vmatprep.subr.bf16.mxu1 %v3878_v45  ;;  %v3954_v44 = vld [vmem:[#allocation9 + $0x8] ss:$16 sps:$4 sm:$0xff]   ;;  %v1064_v45 = vpack.c.bf16 %v1060_v41, %v1060_v41  ;;  %v4040_v41 = vld [vmem:[#allocation9 + $0x1cc] ss:$16 sps:$4 sm:$0xff]  }
 0x1b3   :  { %1904 = vmatpush1.bf16.msra.mxu0 %v3873_v46  ;;  %1986 = vmatpush1.bf16.msra.mxu1 %v3876_v47  ;;  %v3962_v46 = vld [vmem:[#allocation9 + $0x2c] ss:$16 sps:$4 sm:$0xff]   ;;  %v3957_v47 = vld [vmem:[#allocation9 + $0x20] ss:$16 sps:$4 sm:$0xff]  }
 0x1b4   :  { %1905 = vmatprep.subr.bf16.mxu0 %v3881_v48  ;;  %1987 = vmatprep.subr.bf16.mxu1 %v3884_v49  ;;  %v3960_v48 = vld [vmem:[#allocation9 + $0x28] ss:$16 sps:$4 sm:$0xff]   ;;  %v3965_v49 = vld [vmem:[#allocation9 + $0x44] ss:$16 sps:$4 sm:$0xff]  }
 0x1b7   :  { %1906 = vmatpush1.bf16.msra.mxu0 %v3879_v50  ;;  %1988 = vmatpush1.bf16.msra.mxu1 %v3882_v51  ;;  %v3968_v50 = vld [vmem:[#allocation9 + $0x4c] ss:$16 sps:$4 sm:$0xff]   ;;  %v3963_v51 = vld [vmem:[#allocation9 + $0x40] ss:$16 sps:$4 sm:$0xff]  }
 0x1b8   :  { %1907 = vmatprep.subr.bf16.mxu0 %v3887_v52  ;;  %1989 = vmatprep.subr.bf16.mxu1 %v3890_v53  ;;  %v3966_v52 = vld [vmem:[#allocation9 + $0x48] ss:$16 sps:$4 sm:$0xff]   ;;  %v3971_v53 = vld [vmem:[#allocation9 + $0x64] ss:$16 sps:$4 sm:$0xff]  }
 0x1bb   :  { %1908 = vmatpush1.bf16.msra.mxu0 %v3885_v54  ;;  %1990 = vmatpush1.bf16.msra.mxu1 %v3888_v55  ;;  %v3974_v54 = vld [vmem:[#allocation9 + $0x6c] ss:$16 sps:$4 sm:$0xff]   ;;  %v3969_v55 = vld [vmem:[#allocation9 + $0x60] ss:$16 sps:$4 sm:$0xff]  }
 0x1bc   :  { %1909 = vmatprep.subr.bf16.mxu0 %v3893_v56  ;;  %1991 = vmatprep.subr.bf16.mxu1 %v3896_v57  ;;  %v3972_v56 = vld [vmem:[#allocation9 + $0x68] ss:$16 sps:$4 sm:$0xff]   ;;  %v3977_v57 = vld [vmem:[#allocation9 + $0x84] ss:$16 sps:$4 sm:$0xff]  }
 0x1bf   :  { %1910 = vmatpush1.bf16.msra.mxu0 %v3891_v58  ;;  %1992 = vmatpush1.bf16.msra.mxu1 %v3894_v59  ;;  %v3980_v58 = vld [vmem:[#allocation9 + $0x8c] ss:$16 sps:$4 sm:$0xff]   ;;  %v3975_v59 = vld [vmem:[#allocation9 + $0x80] ss:$16 sps:$4 sm:$0xff]  }
 0x1c0   :  { %1911 = vmatprep.subr.bf16.mxu0 %v3899_v60  ;;  %1993 = vmatprep.subr.bf16.mxu1 %v3902_v61  ;;  %v3978_v60 = vld [vmem:[#allocation9 + $0x88] ss:$16 sps:$4 sm:$0xff]   ;;  %v3983_v61 = vld [vmem:[#allocation9 + $0xa4] ss:$16 sps:$4 sm:$0xff]  }
 0x1c3   :  { %1912 = vmatpush1.bf16.msra.mxu0 %v3897_v62  ;;  %1994 = vmatpush1.bf16.msra.mxu1 %v3900_v63  ;;  %v3986_v62 = vld [vmem:[#allocation9 + $0xac] ss:$16 sps:$4 sm:$0xff]   ;;  %v3981_v63 = vld [vmem:[#allocation9 + $0xa0] ss:$16 sps:$4 sm:$0xff]  }
 0x1c4   :  { %1913 = vmatprep.subr.bf16.mxu0 %v3905_v0  ;;  %1995 = vmatprep.subr.bf16.mxu1 %v3908_v1  ;;  %v3984_v0 = vld [vmem:[#allocation9 + $0xa8] ss:$16 sps:$4 sm:$0xff]   ;;  %v3989_v1 = vld [vmem:[#allocation9 + $0xc4] ss:$16 sps:$4 sm:$0xff]  }
 0x1c7   :  { %1914 = vmatpush1.bf16.msra.mxu0 %v3903_v2  ;;  %1996 = vmatpush1.bf16.msra.mxu1 %v3906_v3  ;;  %v3992_v2 = vld [vmem:[#allocation9 + $0xcc] ss:$16 sps:$4 sm:$0xff]   ;;  %v3987_v3 = vld [vmem:[#allocation9 + $0xc0] ss:$16 sps:$4 sm:$0xff]  }
 0x1c8   :  { %1915 = vmatprep.subr.bf16.mxu0 %v3911_v4  ;;  %1997 = vmatprep.subr.bf16.mxu1 %v3914_v5  ;;  %v3990_v4 = vld [vmem:[#allocation9 + $0xc8] ss:$16 sps:$4 sm:$0xff]   ;;  %v3995_v5 = vld [vmem:[#allocation9 + $0xe4] ss:$16 sps:$4 sm:$0xff]  }
 0x1cb   :  { %1916 = vmatpush1.bf16.msra.mxu0 %v3909_v6  ;;  %1998 = vmatpush1.bf16.msra.mxu1 %v3912_v7  ;;  %v3998_v6 = vld [vmem:[#allocation9 + $0xec] ss:$16 sps:$4 sm:$0xff]   ;;  %v3993_v7 = vld [vmem:[#allocation9 + $0xe0] ss:$16 sps:$4 sm:$0xff]  }
 0x1cc   :  { %1917 = vmatprep.subr.bf16.mxu0 %v3917_v8  ;;  %1999 = vmatprep.subr.bf16.mxu1 %v3920_v14  ;;  %v3996_v8 = vld [vmem:[#allocation9 + $0xe8] ss:$16 sps:$4 sm:$0xff]   ;;  %v4001_v14 = vld [vmem:[#allocation9 + $0x104] ss:$16 sps:$4 sm:$0xff]  }
 0x1cf   :  { %1918 = vmatpush1.bf16.msra.mxu0 %v3915_v15  ;;  %2000 = vmatpush1.bf16.msra.mxu1 %v3918_v16  ;;  %v4004_v15 = vld [vmem:[#allocation9 + $0x10c] ss:$16 sps:$4 sm:$0xff]   ;;  %v3999_v16 = vld [vmem:[#allocation9 + $0x100] ss:$16 sps:$4 sm:$0xff]  }
 0x1d0   :  { %1919 = vmatprep.subr.bf16.mxu0 %v3923_v17  ;;  %2001 = vmatprep.subr.bf16.mxu1 %v3926_v19  ;;  %v4002_v17 = vld [vmem:[#allocation9 + $0x108] ss:$16 sps:$4 sm:$0xff]   ;;  %v4007_v19 = vld [vmem:[#allocation9 + $0x124] ss:$16 sps:$4 sm:$0xff]  }
 0x1d3   :  { %1920 = vmatpush1.bf16.msra.mxu0 %v3921_v20  ;;  %2002 = vmatpush1.bf16.msra.mxu1 %v3924_v21  ;;  %v4010_v20 = vld [vmem:[#allocation9 + $0x12c] ss:$16 sps:$4 sm:$0xff]   ;;  %v4005_v21 = vld [vmem:[#allocation9 + $0x120] ss:$16 sps:$4 sm:$0xff]  }
 0x1d4   :  { %1921 = vmatprep.subr.bf16.mxu0 %v3929_v22  ;;  %2003 = vmatprep.subr.bf16.mxu1 %v3932_v23  ;;  %v4008_v22 = vld [vmem:[#allocation9 + $0x128] ss:$16 sps:$4 sm:$0xff]   ;;  %v4013_v23 = vld [vmem:[#allocation9 + $0x144] ss:$16 sps:$4 sm:$0xff]  }
 0x1d7   :  { %1922 = vmatpush1.bf16.msra.mxu0 %v3927_v24  ;;  %2004 = vmatpush1.bf16.msra.mxu1 %v3930_v25  ;;  %v4016_v24 = vld [vmem:[#allocation9 + $0x14c] ss:$16 sps:$4 sm:$0xff]   ;;  %v4011_v25 = vld [vmem:[#allocation9 + $0x140] ss:$16 sps:$4 sm:$0xff]  }
 0x1d8   :  { %1923 = vmatprep.subr.bf16.mxu0 %v3935_v27  ;;  %2005 = vmatprep.subr.bf16.mxu1 %v3938_v28  ;;  %v4014_v27 = vld [vmem:[#allocation9 + $0x148] ss:$16 sps:$4 sm:$0xff]   ;;  %v4019_v28 = vld [vmem:[#allocation9 + $0x164] ss:$16 sps:$4 sm:$0xff]  }
 0x1db   :  { %1924 = vmatpush1.bf16.msra.mxu0 %v3933_v29  ;;  %2006 = vmatpush1.bf16.msra.mxu1 %v3936_v30  ;;  %v4022_v29 = vld [vmem:[#allocation9 + $0x16c] ss:$16 sps:$4 sm:$0xff]   ;;  %v4017_v30 = vld [vmem:[#allocation9 + $0x160] ss:$16 sps:$4 sm:$0xff]  }
 0x1dc   :  { %1925 = vmatprep.subr.bf16.mxu0 %v3941_v32  ;;  %2007 = vmatprep.subr.bf16.mxu1 %v3944_v33  ;;  %v4025_v32 = vld [vmem:[#allocation9 + $0x184] ss:$16 sps:$4 sm:$0xff]   ;;  %v4028_v33 = vld [vmem:[#allocation9 + $0x18c] ss:$16 sps:$4 sm:$0xff]  }
 0x1df   :  { %1926 = vmatpush1.bf16.msra.mxu0 %v3939_v34  ;;  %2008 = vmatpush1.bf16.msra.mxu1 %v3942_v35  ;;  %v4023_v34 = vld [vmem:[#allocation9 + $0x180] ss:$16 sps:$4 sm:$0xff]   ;;  %v4026_v35 = vld [vmem:[#allocation9 + $0x188] ss:$16 sps:$4 sm:$0xff]  }
 0x1e0   :  { %1927 = vmatprep.subr.bf16.mxu0 %v3947_v37  ;;  %2009 = vmatprep.subr.bf16.mxu1 %v3950_v38  ;;  %v4034_v37 = vld [vmem:[#allocation9 + $0x1ac] ss:$16 sps:$4 sm:$0xff]   ;;  %v4029_v38 = vld [vmem:[#allocation9 + $0x1a0] ss:$16 sps:$4 sm:$0xff]  }
 0x1e3   :  { %1928 = vmatpush1.bf16.msra.mxu0 %v3945_v39  ;;  %2010 = vmatpush1.bf16.msra.mxu1 %v3948_v40  ;;  %v4032_v39 = vld [vmem:[#allocation9 + $0x1a8] ss:$16 sps:$4 sm:$0xff]   ;;  %v4037_v40 = vld [vmem:[#allocation9 + $0x1c4] ss:$16 sps:$4 sm:$0xff]  }
 0x1e4   :  { %2818 = vmatprep.subr.bf16.mxu0 %v3953_v11  ;;  %2900 = vmatprep.subr.bf16.mxu1 %v3956_v42  ;;  %v4035_v11 = vld [vmem:[#allocation9 + $0x1c0] ss:$16 sps:$4 sm:$0xff]   ;;  %v4038_v42 = vld [vmem:[#allocation9 + $0x1c8] ss:$16 sps:$4 sm:$0xff]  }
 0x1e6   :  { %1930 = vmatmul.mubr.bf16.vlgmr.msra.gmra.mrb[4].mxu0 %v1064_v45  ;;  %2012 = vmatmul.mubr.bf16.vlgmr.msra.gmra.mrb[4].mxu1 %v1064_v45  ;;  %v4041_v45 = vld [vmem:[#allocation9 + $0x1e0] ss:$16 sps:$4 sm:$0xff]  }
 0x1e7   :  { %2819 = vmatpush1.bf16.msra.mxu0 %v3951_v43  ;;  %2901 = vmatpush1.bf16.msra.mxu1 %v3954_v44  ;;  %v4043_v43 = vld [vmem:[#allocation9 + $0x1e4] ss:$16 sps:$4 sm:$0xff]   ;;  %v4046_v44 = vld [vmem:[#allocation9 + $0x1ec] ss:$16 sps:$4 sm:$0xff]  }
 0x1e8   :  { %2820 = vmatprep.subr.bf16.mxu0 %v3959_v18  ;;  %2902 = vmatprep.subr.bf16.mxu1 %v3962_v46  ;;  %v4044_v18 = vld [vmem:[#allocation9 + $0x1e8] ss:$16 sps:$4 sm:$0xff]   ;;  %v4049_v46 = vld [vmem:[#allocation9 + $0x204] ss:$16 sps:$4 sm:$0xff]  }
 0x1eb   :  { %2821 = vmatpush1.bf16.msra.mxu0 %v3957_v47  ;;  %2903 = vmatpush1.bf16.msra.mxu1 %v3960_v48  ;;  %v4052_v47 = vld [vmem:[#allocation9 + $0x20c] ss:$16 sps:$4 sm:$0xff]   ;;  %v4419_v48 = vld [vmem:[%s4462_s4] sm:$0xf] }
 0x1ec   :  { %2822 = vmatprep.subr.bf16.mxu0 %v3965_v49  ;;  %2904 = vmatprep.subr.bf16.mxu1 %v3968_v50  ;;  %v1199_v49 = vrot.slane %v4419_v48, %v4389_v10  ;;  %v1203_v50 = vrot.slane %v4419_v48, %v4397_v12 }
 0x1ef   :  { %2823 = vmatpush1.bf16.msra.mxu0 %v3963_v51  ;;  %2905 = vmatpush1.bf16.msra.mxu1 %v3966_v52  ;;  %v1211_v51 = vrot.slane %v4419_v48, %v4400_v13 }
 0x1f0   :  { %2824 = vmatprep.subr.bf16.mxu0 %v3971_v53  ;;  %2906 = vmatprep.subr.bf16.mxu1 %v3974_v54 }
 0x1f3   :  { %2825 = vmatpush1.bf16.msra.mxu0 %v3969_v55  ;;  %2907 = vmatpush1.bf16.msra.mxu1 %v3972_v56 }
 0x1f4   :  { %2826 = vmatprep.subr.bf16.mxu0 %v3977_v57  ;;  %2908 = vmatprep.subr.bf16.mxu1 %v3980_v58 }
 0x1f7   :  { %2827 = vmatpush1.bf16.msra.mxu0 %v3975_v59  ;;  %2909 = vmatpush1.bf16.msra.mxu1 %v3978_v60 }
 0x1f8   :  { %2828 = vmatprep.subr.bf16.mxu0 %v3983_v61  ;;  %2910 = vmatprep.subr.bf16.mxu1 %v3986_v62 }
 0x1fb   :  { %2829 = vmatpush1.bf16.msra.mxu0 %v3981_v63  ;;  %2911 = vmatpush1.bf16.msra.mxu1 %v3984_v0 }
 0x1fc   :  { %2830 = vmatprep.subr.bf16.mxu0 %v3989_v1  ;;  %2912 = vmatprep.subr.bf16.mxu1 %v3992_v2 }
 0x1ff   :  { %2831 = vmatpush1.bf16.msra.mxu0 %v3987_v3  ;;  %2913 = vmatpush1.bf16.msra.mxu1 %v3990_v4  ;;  %v4047_v3 = vld [vmem:[#allocation9 + $0x200] ss:$16 sps:$4 sm:$0xff]   ;;  %v4050_v4 = vld [vmem:[#allocation9 + $0x208] ss:$16 sps:$4 sm:$0xff]  }
 0x200   :  { %2832 = vmatprep.subr.bf16.mxu0 %v3995_v5  ;;  %2914 = vmatprep.subr.bf16.mxu1 %v3998_v6  ;;  %v4055_v6 = vld [vmem:[#allocation9 + $0x224] ss:$16 sps:$4 sm:$0xff]  }
 0x203   :  { %2833 = vmatpush1.bf16.msra.mxu0 %v3993_v7  ;;  %2915 = vmatpush1.bf16.msra.mxu1 %v3996_v8  ;;  %v4058_v7 = vld [vmem:[#allocation9 + $0x22c] ss:$16 sps:$4 sm:$0xff]  }
 0x204   :  { %2834 = vmatprep.subr.bf16.mxu0 %v4001_v14  ;;  %2916 = vmatprep.subr.bf16.mxu1 %v4004_v15  ;;  %v4053_v14 = vld [vmem:[#allocation9 + $0x220] ss:$16 sps:$4 sm:$0xff]   ;;  %v4056_v15 = vld [vmem:[#allocation9 + $0x228] ss:$16 sps:$4 sm:$0xff]  }
 0x207   :  { %2835 = vmatpush1.bf16.msra.mxu0 %v3999_v16  ;;  %2917 = vmatpush1.bf16.msra.mxu1 %v4002_v17  ;;  %v4061_v16 = vld [vmem:[#allocation9 + $0x244] ss:$16 sps:$4 sm:$0xff]   ;;  %v4064_v17 = vld [vmem:[#allocation9 + $0x24c] ss:$16 sps:$4 sm:$0xff]  }
 0x208   :  { %2836 = vmatprep.subr.bf16.mxu0 %v4007_v19  ;;  %2918 = vmatprep.subr.bf16.mxu1 %v4010_v20  ;;  %v4059_v19 = vld [vmem:[#allocation9 + $0x240] ss:$16 sps:$4 sm:$0xff]   ;;  %v4062_v20 = vld [vmem:[#allocation9 + $0x248] ss:$16 sps:$4 sm:$0xff]  }
 0x20b   :  { %2837 = vmatpush1.bf16.msra.mxu0 %v4005_v21  ;;  %2919 = vmatpush1.bf16.msra.mxu1 %v4008_v22  ;;  %v4067_v21 = vld [vmem:[#allocation9 + $0x264] ss:$16 sps:$4 sm:$0xff]   ;;  %v4070_v22 = vld [vmem:[#allocation9 + $0x26c] ss:$16 sps:$4 sm:$0xff]  }
 0x20c   :  { %2838 = vmatprep.subr.bf16.mxu0 %v4013_v23  ;;  %2920 = vmatprep.subr.bf16.mxu1 %v4016_v24  ;;  %v4065_v23 = vld [vmem:[#allocation9 + $0x260] ss:$16 sps:$4 sm:$0xff]   ;;  %v4068_v24 = vld [vmem:[#allocation9 + $0x268] ss:$16 sps:$4 sm:$0xff]  }
 0x20f   :  { %2839 = vmatpush1.bf16.msra.mxu0 %v4011_v25  ;;  %2921 = vmatpush1.bf16.msra.mxu1 %v4014_v27  ;;  %v4073_v25 = vld [vmem:[#allocation9 + $0x284] ss:$16 sps:$4 sm:$0xff]   ;;  %v4076_v27 = vld [vmem:[#allocation9 + $0x28c] ss:$16 sps:$4 sm:$0xff]  }
 0x210   :  { %2840 = vmatprep.subr.bf16.mxu0 %v4019_v28  ;;  %2922 = vmatprep.subr.bf16.mxu1 %v4022_v29  ;;  %v4071_v28 = vld [vmem:[#allocation9 + $0x280] ss:$16 sps:$4 sm:$0xff]   ;;  %v4074_v29 = vld [vmem:[#allocation9 + $0x288] ss:$16 sps:$4 sm:$0xff]  }
 0x213   :  { %2841 = vmatpush1.bf16.msra.mxu0 %v4017_v30  ;;  %2923 = vmatpush1.bf16.msra.mxu1 %v4020_v31  ;;  %v4079_v30 = vld [vmem:[#allocation9 + $0x2a4] ss:$16 sps:$4 sm:$0xff]   ;;  %v4082_v31 = vld [vmem:[#allocation9 + $0x2ac] ss:$16 sps:$4 sm:$0xff]  }
 0x214   :  { %2842 = vmatprep.subr.bf16.mxu0 %v4025_v32  ;;  %2924 = vmatprep.subr.bf16.mxu1 %v4028_v33  ;;  %v4077_v32 = vld [vmem:[#allocation9 + $0x2a0] ss:$16 sps:$4 sm:$0xff]   ;;  %v4080_v33 = vld [vmem:[#allocation9 + $0x2a8] ss:$16 sps:$4 sm:$0xff]  }
 0x217   :  { %2843 = vmatpush1.bf16.msra.mxu0 %v4023_v34  ;;  %2925 = vmatpush1.bf16.msra.mxu1 %v4026_v35  ;;  %v4085_v34 = vld [vmem:[#allocation9 + $0x2c4] ss:$16 sps:$4 sm:$0xff]   ;;  %v4088_v35 = vld [vmem:[#allocation9 + $0x2cc] ss:$16 sps:$4 sm:$0xff]  }
 0x218   :  { %2844 = vmatprep.subr.bf16.mxu0 %v4031_v36  ;;  %2926 = vmatprep.subr.bf16.mxu1 %v4034_v37  ;;  %v4083_v36 = vld [vmem:[#allocation9 + $0x2c0] ss:$16 sps:$4 sm:$0xff]   ;;  %v4086_v37 = vld [vmem:[#allocation9 + $0x2c8] ss:$16 sps:$4 sm:$0xff]  }
 0x21b   :  { %2845 = vmatpush1.bf16.msra.mxu0 %v4029_v38  ;;  %2927 = vmatpush1.bf16.msra.mxu1 %v4032_v39  ;;  %v4091_v38 = vld [vmem:[#allocation9 + $0x2e4] ss:$16 sps:$4 sm:$0xff]   ;;  %v4094_v39 = vld [vmem:[#allocation9 + $0x2ec] ss:$16 sps:$4 sm:$0xff]  }
 0x21c   :  { %2846 = vmatprep.subr.bf16.mxu0 %v4037_v40  ;;  %2928 = vmatprep.subr.bf16.mxu1 %v4040_v41  ;;  %v4089_v40 = vld [vmem:[#allocation9 + $0x2e0] ss:$16 sps:$4 sm:$0xff]   ;;  %v4092_v41 = vld [vmem:[#allocation9 + $0x2e8] ss:$16 sps:$4 sm:$0xff]  }
 0x21f   :  { %2847 = vmatpush1.bf16.msra.mxu0 %v4035_v11  ;;  %2929 = vmatpush1.bf16.msra.mxu1 %v4038_v42  ;;  %v4097_v11 = vld [vmem:[#allocation9 + $0x304] ss:$16 sps:$4 sm:$0xff]   ;;  %v4100_v42 = vld [vmem:[#allocation9 + $0x30c] ss:$16 sps:$4 sm:$0xff]  }
 0x220   :  { %2848 = vmatprep.subr.bf16.mxu0 %v4043_v43  ;;  %2930 = vmatprep.subr.bf16.mxu1 %v4046_v44  ;;  %v4095_v43 = vld [vmem:[#allocation9 + $0x300] ss:$16 sps:$4 sm:$0xff]   ;;  %v4098_v44 = vld [vmem:[#allocation9 + $0x308] ss:$16 sps:$4 sm:$0xff]  }
 0x223   :  { %2849 = vmatpush1.bf16.msra.mxu0 %v4041_v45  ;;  %2931 = vmatpush1.bf16.msra.mxu1 %v4044_v18  ;;  %v4103_v45 = vld [vmem:[#allocation9 + $0x324] ss:$16 sps:$4 sm:$0xff]   ;;  %v4106_v18 = vld [vmem:[#allocation9 + $0x32c] ss:$16 sps:$4 sm:$0xff]  }
 0x224   :  { %2859 = vmatprep.subr.bf16.mxu0 %v4049_v46  ;;  %2941 = vmatprep.subr.bf16.mxu1 %v4052_v47  ;;  %v4101_v46 = vld [vmem:[#allocation9 + $0x320] ss:$16 sps:$4 sm:$0xff]   ;;  %v4104_v47 = vld [vmem:[#allocation9 + $0x328] ss:$16 sps:$4 sm:$0xff]  }
 0x2b9   :  { %v1931_v52 = vpop.f32.mrb[4].mxu0  ;;  %v4427_v53 = vpop.f32.mrb[4].mxu1 }
 0x2ba   :  { %v3521_v54 = vadd.f32 %v1931_v52, %v1199_v49  ;;  %v1933_v55 = vpop.f32.mrb[5].mxu0  ;;  %v2015_v56 = vpop.f32.mrb[5].mxu1  ;;  %v4109_v49 = vld [vmem:[#allocation9 + $0x344] ss:$16 sps:$4 sm:$0xff]   ;;  %v4110_v52 = vld [vmem:[#allocation9 + $0x348] ss:$16 sps:$4 sm:$0xff]  }
 0x2bb   :  { %v3522_v57 = vadd.f32 %v1933_v55, %v1203_v50  ;;  %v3524_v58 = vadd.f32 %v2015_v56, %v1211_v51  ;;  %v1935_v59 = vpop.f32.mrb[6].mxu0  ;;  %v2017_v60 = vpop.f32.mrb[6].mxu1  ;;  %v4112_v50 = vld [vmem:[#allocation9 + $0x34c] ss:$16 sps:$4 sm:$0xff]   ;;  %v4107_v51 = vld [vmem:[#allocation9 + $0x340] ss:$16 sps:$4 sm:$0xff]  }
 0x2bc   :  { %v2020_v61 = vmax.f32 %v3521_v54, 0.0  ;;  %v1936_v62 = vpop.f32.mrb[7].mxu0  ;;  %v2018_v63 = vpop.f32.mrb[7].mxu1  ;;  %v4115_v54 = vld [vmem:[#allocation9 + $0x364] ss:$16 sps:$4 sm:$0xff]  }
 0x2bd   :  { %v2021_v0 = vmax.f32 %v3522_v57, 0.0  ;;  %v2023_v1 = vmax.f32 %v3524_v58, 0.0  ;;  %v4118_v55 = vld [vmem:[#allocation9 + $0x36c] ss:$16 sps:$4 sm:$0xff]   ;;  %v4113_v56 = vld [vmem:[#allocation9 + $0x360] ss:$16 sps:$4 sm:$0xff]  }
 0x2be   :  { %v2024_v5 = vpack.c.bf16 %v2020_v61, %v2020_v61  ;;  %v4116_v57 = vld [vmem:[#allocation9 + $0x368] ss:$16 sps:$4 sm:$0xff]   ;;  %v4121_v58 = vld [vmem:[#allocation9 + $0x384] ss:$16 sps:$4 sm:$0xff]   ;;  %v4124_v59 = vld [vmem:[#allocation9 + $0x38c] ss:$16 sps:$4 sm:$0xff]  }
 0x2bf   :  { %v2025_v2 = vpack.c.bf16 %v2021_v0, %v2021_v0  ;;  %v2027_v8 = vpack.c.bf16 %v2023_v1, %v2023_v1  ;;  %v4119_v60 = vld [vmem:[#allocation9 + $0x380] ss:$16 sps:$4 sm:$0xff]   ;;  %v4122_v61 = vld [vmem:[#allocation9 + $0x388] ss:$16 sps:$4 sm:$0xff]   ;;  %v4127_v62 = vld [vmem:[#allocation9 + $0x3a4] ss:$16 sps:$4 sm:$0xff]  }
 0x2c0   :  { %v4130_v63 = vld [vmem:[#allocation9 + $0x3ac] ss:$16 sps:$4 sm:$0xff]   ;;  %v4125_v0 = vld [vmem:[#allocation9 + $0x3a0] ss:$16 sps:$4 sm:$0xff]   ;;  %v4128_v1 = vld [vmem:[#allocation9 + $0x3a8] ss:$16 sps:$4 sm:$0xff]  }
 0x2c1   :  { %2850 = vmatprep.mubr.bf16.mxu0 %v2025_v2  ;;  %2932 = vmatprep.mubr.bf16.mxu1 %v2025_v2  ;;  %v1207_v2 = vrot.slane %v4419_v48, %v4411_v26 }
 0x2c2   :  { %2851 = vmatmul.mubr.bf16.vlgmr.msra.gmra.mrb[8].mxu0 %v2024_v5  ;;  %2933 = vmatmul.mubr.bf16.vlgmr.msra.gmra.mrb[8].mxu1 %v2024_v5  ;;  %v4131_v5 = vld [vmem:[#allocation9 + $0x3c0] ss:$16 sps:$4 sm:$0xff]  }
 0x2c3   :  { %2860 = vmatpush1.bf16.msra.mxu0 %v4047_v3  ;;  %2942 = vmatpush1.bf16.msra.mxu1 %v4050_v4  ;;  %v4133_v3 = vld [vmem:[#allocation9 + $0x3c4] ss:$16 sps:$4 sm:$0xff]   ;;  %v4136_v4 = vld [vmem:[#allocation9 + $0x3cc] ss:$16 sps:$4 sm:$0xff]  }
 0x2c4   :  { %2891 = vmatprep.mubr.bf16.mxu0 %v2027_v8  ;;  %2973 = vmatprep.mubr.bf16.mxu1 %v2027_v8  ;;  %v4139_v8 = vld [vmem:[#allocation9 + $0x3e4] ss:$16 sps:$4 sm:$0xff]  }
 0x2c5   :  { %2861 = vmatprep.subr.bf16.mxu0 %v4055_v6  ;;  %2943 = vmatprep.subr.bf16.mxu1 %v4058_v7  ;;  %v4134_v6 = vld [vmem:[#allocation9 + $0x3c8] ss:$16 sps:$4 sm:$0xff]   ;;  %v3523_v7 = vadd.f32 %v4427_v53, %v1207_v2  ;;  %v3515_v53 = vld.sshfl [vmem:[%s4465_s7] sm:$0x33 pattern:$0x75316420] }
 0x2c7   :  { %2862 = vmatpush1.bf16.msra.mxu0 %v4053_v14  ;;  %2944 = vmatpush1.bf16.msra.mxu1 %v4056_v15  ;;  %v4142_v14 = vld [vmem:[#allocation9 + $0x3ec] ss:$16 sps:$4 sm:$0xff]   ;;  %v4137_v15 = vld [vmem:[#allocation9 + $0x3e0] ss:$16 sps:$4 sm:$0xff]  }
 0x2c8   :  { %2863 = vmatprep.subr.bf16.mxu0 %v4061_v16  ;;  %2945 = vmatprep.subr.bf16.mxu1 %v4064_v17  ;;  %v4140_v16 = vld [vmem:[#allocation9 + $0x3e8] ss:$16 sps:$4 sm:$0xff]   ;;  %v2022_v17 = vmax.f32 %v3523_v7, 0.0 }
 0x2ca   :  { %v2026_v48 = vpack.c.bf16 %v2022_v17, %v2022_v17 }
 0x2cb   :  { %2864 = vmatpush1.bf16.msra.mxu0 %v4059_v19  ;;  %2946 = vmatpush1.bf16.msra.mxu1 %v4062_v20  ;;  %v4271_v19 = vmov 1966171168  }
 0x2cc   :  { %2865 = vmatprep.subr.bf16.mxu0 %v4067_v21  ;;  %2947 = vmatprep.subr.bf16.mxu1 %v4070_v22  ;;  %v3003_v20 = vunpack.c.l.s4 %v4271_v19  ;;  %v3001_v22 = vcombine.high %v3515_v53, %v3515_v53 }
 0x2ce   :  { %v3004_v21 = vunpack.c.0.s8 %v3003_v20 }
 0x2cf   :  { %2866 = vmatpush1.bf16.msra.mxu0 %v4065_v23  ;;  %2948 = vmatpush1.bf16.msra.mxu1 %v4068_v24 }
 0x2d0   :  { %2867 = vmatprep.subr.bf16.mxu0 %v4073_v25  ;;  %2949 = vmatprep.subr.bf16.mxu1 %v4076_v27  ;;  %v3007_v23 = vsub.s32 %v3004_v21, %v4386_v9 }
 0x2d2   :  { %v3015_v24 = vrot.slane %v3001_v22, %v3007_v23  ;;  %v3008_v25 = vrot.slane %v3515_v53, %v3007_v23 }
 0x2d3   :  { %2868 = vmatpush1.bf16.msra.mxu0 %v4071_v28  ;;  %2950 = vmatpush1.bf16.msra.mxu1 %v4074_v29  ;;  %v2156_v28 = vld [vmem:[%s4464_s6] sm:$0xf] }
 0x2d4   :  { %2869 = vmatprep.subr.bf16.mxu0 %v4079_v30  ;;  %2951 = vmatprep.subr.bf16.mxu1 %v4082_v31  ;;  %v3017_v27 = vcombine.high %v3015_v24, %v3015_v24  ;;  %v2161_v29 = vrot.slane %v2156_v28, %v4389_v10  ;;  %v2169_v30 = vrot.slane %v2156_v28, %v4411_v26 }
 0x2d5   :  { %v2165_v31 = vrot.slane %v2156_v28, %v4397_v12 }
 0x2d7   :  { %2870 = vmatpush1.bf16.msra.mxu0 %v4077_v32  ;;  %2952 = vmatpush1.bf16.msra.mxu1 %v4080_v33  ;;  %v2173_v32 = vrot.slane %v2156_v28, %v4400_v13 }
 0x2d8   :  { %2871 = vmatprep.subr.bf16.mxu0 %v4085_v34  ;;  %2953 = vmatprep.subr.bf16.mxu1 %v4088_v35 }
 0x2db   :  { %2872 = vmatpush1.bf16.msra.mxu0 %v4083_v36  ;;  %2954 = vmatpush1.bf16.msra.mxu1 %v4086_v37 }
 0x2dc   :  { %2873 = vmatprep.subr.bf16.mxu0 %v4091_v38  ;;  %2955 = vmatprep.subr.bf16.mxu1 %v4094_v39 }
 0x2df   :  { %2874 = vmatpush1.bf16.msra.mxu0 %v4089_v40  ;;  %2956 = vmatpush1.bf16.msra.mxu1 %v4092_v41 }
 0x2e0   :  { %2875 = vmatprep.subr.bf16.mxu0 %v4097_v11  ;;  %2957 = vmatprep.subr.bf16.mxu1 %v4100_v42 }
 0x2e3   :  { %2876 = vmatpush1.bf16.msra.mxu0 %v4095_v43  ;;  %2958 = vmatpush1.bf16.msra.mxu1 %v4098_v44 }
 0x2e4   :  { %2877 = vmatprep.subr.bf16.mxu0 %v4103_v45  ;;  %2959 = vmatprep.subr.bf16.mxu1 %v4106_v18 }
 0x2e7   :  { %2878 = vmatpush1.bf16.msra.mxu0 %v4101_v46  ;;  %2960 = vmatpush1.bf16.msra.mxu1 %v4104_v47  ;;  %v3016_v46 = vcombine.high %v3008_v25, %v3008_v25  ;;  %v2992_v47 = vstv %s4466_s8  ;;  %s4235_s8 = scalar_lea.vmem %s3117_s21, 16 }
 0x2e8   :  { %2879 = vmatprep.subr.bf16.mxu0 %v4109_v49  ;;  %2961 = vmatprep.subr.bf16.mxu1 %v4112_v50  ;;  %p4236_p4 = scmp.ne.s32.totalorder %s3117_s21, %s4235_s8  ;;  %p4241_p6 = scmp.lt.s32.totalorder %s4239_s22, %s4235_s8 }
 0x2ea   :  { %p4242_p7 = por %p4241_p6, %p4240_p5 }
 0x2eb   :  { %2880 = vmatpush1.bf16.msra.mxu0 %v4107_v51  ;;  %2962 = vmatpush1.bf16.msra.mxu1 %v4110_v52 }
 0x2ec   :  { %2881 = vmatprep.subr.bf16.mxu0 %v4115_v54  ;;  %2963 = vmatprep.subr.bf16.mxu1 %v4118_v55  ;;  %p4243_p8 = pnand %p4242_p7, %p4236_p4 }
 0x2ef   :  { %2882 = vmatpush1.bf16.msra.mxu0 %v4113_v56  ;;  %2964 = vmatpush1.bf16.msra.mxu1 %v4116_v57 }
 0x2f0   :  { %2883 = vmatprep.subr.bf16.mxu0 %v4121_v58  ;;  %2965 = vmatprep.subr.bf16.mxu1 %v4124_v59 }
 0x2f3   :  { %2884 = vmatpush1.bf16.msra.mxu0 %v4119_v60  ;;  %2966 = vmatpush1.bf16.msra.mxu1 %v4122_v61 }
 0x2f4   :  { %2885 = vmatprep.subr.bf16.mxu0 %v4127_v62  ;;  %2967 = vmatprep.subr.bf16.mxu1 %v4130_v63 }
 0x2f7   :  { %2886 = vmatpush1.bf16.msra.mxu0 %v4125_v0  ;;  %2968 = vmatpush1.bf16.msra.mxu1 %v4128_v1 }
 0x2f8   :  { %2887 = vmatprep.subr.bf16.mxu0 %v4133_v3  ;;  %2969 = vmatprep.subr.bf16.mxu1 %v4136_v4 }
 0x2fb   :  { %2888 = vmatpush1.bf16.msra.mxu0 %v4131_v5  ;;  %2970 = vmatpush1.bf16.msra.mxu1 %v4134_v6 }
 0x2fc   :  { %2889 = vmatprep.subr.bf16.mxu0 %v4139_v8  ;;  %2971 = vmatprep.subr.bf16.mxu1 %v4142_v14 }
 0x2ff   :  { %2890 = vmatpush1.bf16.msra.mxu0 %v4137_v15  ;;  %2972 = vmatpush1.bf16.msra.mxu1 %v4140_v16 }
 0x302   :  { %2892 = vmatmul.mubr.bf16.vlgmr.msra.gmra.mrb[8].mxu0 %v2026_v48  ;;  %2974 = vmatmul.mubr.bf16.vlgmr.msra.gmra.mrb[8].mxu1 %v2026_v48 }
 0x303   :  { %3054 = vmatprep.mubr.bf16.mxu1 %v3015_v24  ;;  %3094 = vmatprep.mubr.bf16.mxu0 %v3017_v27 }
 0x3d5   :  { %v2893_v33 = vpop.f32.mrb[8].mxu0  ;;  %v2975_v34 = vpop.f32.mrb[8].mxu1 }
 0x3d6   :  { %v3525_v9 = vadd.f32 %v2893_v33, %v2161_v29  ;;  %v3527_v35 = vadd.f32 %v2975_v34, %v2169_v30  ;;  %v2895_v36 = vpop.f32.mrb[9].mxu0  ;;  %v2977_v37 = vpop.f32.mrb[9].mxu1 }
 0x3d7   :  { %v3526_v38 = vadd.f32 %v2895_v36, %v2165_v31  ;;  %v3528_v39 = vadd.f32 %v2977_v37, %v2173_v32  ;;  %v2897_v40 = vpop.f32.mrb[10].mxu0  ;;  %v2979_v41 = vpop.f32.mrb[10].mxu1 }
 0x3d8   :  { %v2982_v11 = vmax.f32 %v3525_v9, 0.0  ;;  %v2984_v42 = vmax.f32 %v3527_v35, 0.0  ;;  %v2898_v43 = vpop.f32.mrb[11].mxu0  ;;  %v2980_v10 = vpop.f32.mrb[11].mxu1 }
 0x3d9   :  { %v2983_v44 = vmax.f32 %v3526_v38, 0.0  ;;  %v2985_v26 = vmax.f32 %v3528_v39, 0.0 }
 0x3da   :  { %v2986_v18 = vpack.c.bf16 %v2982_v11, %v2982_v11  ;;  %v2988_v13 = vpack.c.bf16 %v2984_v42, %v2984_v42 }
 0x3db   :  { %v2987_v45 = vpack.c.bf16 %v2983_v44, %v2983_v44  ;;  %v2989_v12 = vpack.c.bf16 %v2985_v26, %v2985_v26 }
 0x3dd   :  { %3022 = vmatprep.subr.bf16.mxu1 %v2987_v45  ;;  %3062 = vmatprep.subr.bf16.mxu0 %v2989_v12 }
 0x3de   :  { %3023 = vmatpush1.bf16.xpose.msra.mxu1 %v2986_v18  ;;  %3063 = vmatpush1.bf16.xpose.msra.mxu0 %v2988_v13 }
 0x3e5   :  { %3055 = vmatmul.mubr.bf16.vlgmr.msra.gmra.mrb[12].mxu1 %v3008_v25  ;;  %3095 = vmatmul.mubr.bf16.vlgmr.msra.gmra.mrb[12].mxu0 %v3016_v46 }
 0x4b8   :  { %v3056_v49 = vpop.f32.mrb[12].mxu1  ;;  %v3096_v50 = vpop.f32.mrb[12].mxu0 }
 0x4b9   :  { %v3057_v51 = vadd.f32 %v3056_v49, %v2992_v47  ;;  %v3058_v52 = vpop.f32.mrb[13].mxu1  ;;  %v3098_v54 = vpop.f32.mrb[13].mxu0 }
 0x4ba   :  { %v3059_v55 = vpop.f32.mrb[14].mxu1  ;;  %v3099_v56 = vpop.f32.mrb[14].mxu0 }
 0x4bb   :  { %v3097_v57 = vadd.f32 %v3096_v50, %v3057_v51  ;;  %v3060_v58 = vpop.f32.mrb[15].mxu1  ;;  %v3100_v59 = vpop.f32.mrb[15].mxu0 }
 0x4bd   :  { %v3516_v60 = vmul.f32 -1.442695, %v3097_v57 }
 0x4bf   :  { %4143 = vpow2.f32 %v3516_v60 }
 0x4c9   :  { %v4144_v61 = vpop.eup %4143 }
 0x4ca   :  { %v3105_v62 = vadd.f32 1.0, %v4144_v61 }
 0x4cc   :  { %4145 = vrcp.f32 %v3105_v62 }
 0x4d6   :  { %v4146_v63 = vpop.eup %4145 }
 0x4d7   :  { %3109 = vst.msk [vmem:[#allocation11] sm:$0x1] %vm3108_vm0, %v4146_v63 }
 0x4d8   :  { %4246 = shalt.err (!%p4243_p8)
}
 0x4d9   :  { %s4247_s0 = scalar_lea.hbm %s4467_s9, 16 }
 0x4da   :  { %p4248_p9 = scmp.ne.s32.totalorder %s4467_s9, %s4247_s0  ;;  %p4251_p10 = scmp.lt.u32.totalorder %s4247_s0, %s4467_s9 }
 0x4dc   :  { %p4253_p11 = pnand %p4251_p10, %p4248_p9 }
 0x4de   :  { %4256 = shalt.err (!%p4253_p11)
}
 0x4df   :  { %3119 = dma.vmem_to_hbm [thread:$0]  %s3117_s21, 16, %s4467_s9, [#allocation5]  }
 0x4e0   :  { %4263 = dma.done.wait [#allocation5], 16  }
 0x4e1   :  { %4264 = vsyncadd [#allocation5], 4294967280 }
 0x4e2   :  { %3123 = vsyncpa [#allocation4], 1 }
 0x4e3   :  { %3124 = vsyncpa [#allocation7], 1 }
 0x4e4   :  { %3125 = vsyncpa [#allocation10], 1 }
 0x4e5   :  { %3126 = vsyncpa [#allocation5], 1 }

</bundles_post_ra>
